<compile_context>
chip_gen: v7x
topology: tpu7x:2x2x1
jax: 0.10.0
libtpu: 0.0.40
codegen_flags: <defaults>
</compile_context>

<pallas_src>
import functools

import jax
import jax.numpy as jnp
import numpy as np
from jax.experimental import pallas as pl
from jax.experimental.pallas import tpu as pltpu


def _round_up(x, m):
    return (x + m - 1) // m * m


def lstm_kernel(x2d_ref, wih_ref, whh_ref, b_ref, wlin_ref, blin_ref,
                out_ref, pre_ref, *, seq_len, batch_pad, hidden_pad):
    """Single-invocation LSTM forward.

    x2d_ref:  (T*Bp, I)     time-major sequence, batch padded to Bp
    wih_ref:  (I, 4*HP)     W_ih^T, each gate block padded to HP lanes
    whh_ref:  (HP, 4*HP)    W_hh^T, padded
    b_ref:    (1, 4*HP)     b_ih + b_hh, padded
    wlin_ref: (HP, OP)      W_lin^T, padded
    blin_ref: (1, OP)       b_lin, padded
    out_ref:  (Bp, OP)      Linear(h_T)  == pred[:, -1]
    pre_ref:  (T*Bp, 4*HP)  VMEM scratch: hoisted input projection
    """
    T, Bp, HP = seq_len, batch_pad, hidden_pad

    # ---- Phase 1: input projection for ALL timesteps as one GEMM (no recurrent
    # dependence, so it sits off the serial critical path).
    pre_ref[...] = (
        jnp.dot(x2d_ref[...], wih_ref[...], preferred_element_type=jnp.float32)
        + b_ref[...]
    )

    # ---- Phase 2: serial recurrence. h/c live in vregs (one (8,128) tile each).
    h = jnp.zeros((Bp, HP), jnp.float32)
    c = jnp.zeros((Bp, HP), jnp.float32)
    # T is small & static -> full unroll (LLO scheduler visibility). For long
    # sequences switch to lax.fori_loop(..., unroll=k) with a pl.ds(t*Bp, Bp)
    # slice of pre_ref.
    for t in range(T):
        gates = pre_ref[t * Bp:(t + 1) * Bp, :] + jnp.dot(
            h, whh_ref[...], preferred_element_type=jnp.float32)   # (Bp, 4*HP)
        # Lane-aligned 128-wide gate blocks; PyTorch gate order i, f, g, o.
        i_g = jax.nn.sigmoid(gates[:, 0 * HP:1 * HP])
        f_g = jax.nn.sigmoid(gates[:, 1 * HP:2 * HP])
        g_g = jnp.tanh(gates[:, 2 * HP:3 * HP])
        o_g = jax.nn.sigmoid(gates[:, 3 * HP:4 * HP])
        c = f_g * c + i_g * g_g
        h = o_g * jnp.tanh(c)

    # ---- Final linear on the last hidden state only (== pred[:, -1]).
    out_ref[...] = (
        jnp.dot(h, wlin_ref[...], preferred_element_type=jnp.float32)
        + blin_ref[...]
    )


def make_params(key, input_size, hidden_size, output_size):
    """PyTorch-shaped nn.LSTM / nn.Linear parameters (gate order i, f, g, o)."""
    k = jax.random.split(key, 6)
    s = 1.0 / np.sqrt(hidden_size)
    return {
        "w_ih": jax.random.uniform(k[0], (4 * hidden_size, input_size), jnp.float32, -s, s),
        "w_hh": jax.random.uniform(k[1], (4 * hidden_size, hidden_size), jnp.float32, -s, s),
        "b_ih": jax.random.uniform(k[2], (4 * hidden_size,), jnp.float32, -s, s),
        "b_hh": jax.random.uniform(k[3], (4 * hidden_size,), jnp.float32, -s, s),
        "w_lin": jax.random.uniform(k[4], (output_size, hidden_size), jnp.float32, -s, s),
        "b_lin": jax.random.uniform(k[5], (output_size,), jnp.float32, -s, s),
    }


def _pad_params(params, HP, OP):
    """Transpose to right-multiply form and pad every gate block to HP lanes.

    Zero padding is numerically inert: padded h/c lanes stay exactly 0 through
    the recurrence (sigmoid(0)=0.5, tanh(0)=0 => c_pad = h_pad = 0), and padded
    W rows/cols contribute exact zeros to every contraction.
    """
    w_ih, w_hh = params["w_ih"], params["w_hh"]
    H = w_hh.shape[1]
    I = w_ih.shape[1]
    O = params["w_lin"].shape[0]
    wih_t = w_ih.T                              # (I, 4H)
    whh_t = w_hh.T                              # (H, 4H)
    b = params["b_ih"] + params["b_hh"]         # (4H,)

    wih_p = jnp.zeros((I, 4 * HP), jnp.float32)
    whh_p = jnp.zeros((HP, 4 * HP), jnp.float32)
    b_p = jnp.zeros((1, 4 * HP), jnp.float32)
    for g in range(4):
        wih_p = wih_p.at[:, g * HP:g * HP + H].set(wih_t[:, g * H:(g + 1) * H])
        whh_p = whh_p.at[:H, g * HP:g * HP + H].set(whh_t[:, g * H:(g + 1) * H])
        b_p = b_p.at[0, g * HP:g * HP + H].set(b[g * H:(g + 1) * H])

    wlin_p = jnp.zeros((HP, OP), jnp.float32).at[:H, :O].set(params["w_lin"].T)
    blin_p = jnp.zeros((1, OP), jnp.float32).at[0, :O].set(params["b_lin"])
    return wih_p, whh_p, b_p, wlin_p, blin_p


def lstm_model_forward(seq, params):
    """seq: [B, T, input_size] float32. Returns pred[:, -1]: [B, output_size].

    Hidden state starts at zero (== reset_hidden(batch_size) before forward()).
    """
    # TODO(synk): persistent self.hidden carried across forward() calls and
    # num_layers > 1 are not implemented; single layer, zero initial state.
    B, T, I = seq.shape
    H = params["w_hh"].shape[1]
    O = params["w_lin"].shape[0]
    HP = _round_up(H, 128)     # lane-aligned per-gate block
    OP = _round_up(O, 128)     # lane-dense output slab
    Bp = _round_up(B, 8)       # sublane-aligned batch

    wih_p, whh_p, b_p, wlin_p, blin_p = _pad_params(params, HP, OP)

    x = jnp.transpose(seq, (1, 0, 2))                   # [T, B, I]
    x = jnp.pad(x, ((0, 0), (0, Bp - B), (0, 0)))       # [T, Bp, I]
    x2d = x.reshape(T * Bp, I)                          # [T*Bp, I]

    kernel = functools.partial(
        lstm_kernel, seq_len=T, batch_pad=Bp, hidden_pad=HP)

    out = pl.pallas_call(
        kernel,
        out_shape=jax.ShapeDtypeStruct((Bp, OP), jnp.float32),
        # Single invocation (no grid): everything is VMEM-resident for the
        # whole kernel -> no per-timestep DMA / grid-step overhead and no
        # double-buffering of the constant weight operands.
        in_specs=[pl.BlockSpec(memory_space=pltpu.MemorySpace.VMEM)
                  for _ in range(6)],
        out_specs=pl.BlockSpec(memory_space=pltpu.MemorySpace.VMEM),
        scratch_shapes=[pltpu.VMEM((T * Bp, 4 * HP), jnp.float32)],
    )(x2d, wih_p, whh_p, b_p, wlin_p, blin_p)
    return out[:B, :O]


def reference_forward(seq, params):
    """Pure-JAX reference of the PyTorch forward (correctness check)."""
    B, T, I = seq.shape
    H = params["w_hh"].shape[1]
    wih_t = params["w_ih"].T
    whh_t = params["w_hh"].T
    b = (params["b_ih"] + params["b_hh"])[None, :]
    h = jnp.zeros((B, H), jnp.float32)
    c = jnp.zeros((B, H), jnp.float32)

    def step(carry, x_t):
        h, c = carry
        gates = x_t @ wih_t + h @ whh_t + b
        i = jax.nn.sigmoid(gates[:, 0 * H:1 * H])
        f = jax.nn.sigmoid(gates[:, 1 * H:2 * H])
        g = jnp.tanh(gates[:, 2 * H:3 * H])
        o = jax.nn.sigmoid(gates[:, 3 * H:4 * H])
        c = f * c + i * g
        h = o * jnp.tanh(c)
        return (h, c), None

    (h, c), _ = jax.lax.scan(step, (h, c), jnp.transpose(seq, (1, 0, 2)))
    return h @ params["w_lin"].T + params["b_lin"][None, :]


if __name__ == "__main__":
    batch, seq_len = 2, 8
    input_size, hidden_size, output_size = 16, 32, 8

    key = jax.random.PRNGKey(0)
    kp, kx = jax.random.split(key)
    params = make_params(kp, input_size, hidden_size, output_size)
    seq = jax.random.normal(kx, (batch, seq_len, input_size), jnp.float32)

    out = jax.block_until_ready(lstm_model_forward(seq, params))
    ref = jax.block_until_ready(reference_forward(seq, params))

    assert out.shape == (batch, output_size)
    np.testing.assert_allclose(np.asarray(out), np.asarray(ref),
                               rtol=1e-5, atol=2e-5)
    print("KERNEL_OK")
</pallas_src>

<mosaic_0001>
module attributes {stable_mosaic.version = 11 : i64} {
  func.func @lstm_kernel(%arg0: memref<64x16xf32, #tpu.memory_space<vmem>>, %arg1: memref<16x512xf32, #tpu.memory_space<vmem>>, %arg2: memref<128x512xf32, #tpu.memory_space<vmem>>, %arg3: memref<1x512xf32, #tpu.memory_space<vmem>>, %arg4: memref<128x128xf32, #tpu.memory_space<vmem>>, %arg5: memref<1x128xf32, #tpu.memory_space<vmem>>, %arg6: memref<8x128xf32, #tpu.memory_space<vmem>>, %arg7: memref<64x512xf32, #tpu.memory_space<vmem>>) attributes {dimension_semantics = [], scalar_prefetch = 0 : i64, scratch_operands = 1 : i64, tpu.core_type = #tpu.core_type<tc>} {
    %c0 = arith.constant 0 : index
    %c0_0 = arith.constant 0 : index
    %0 = vector.load %arg0[%c0, %c0_0] : memref<64x16xf32, #tpu.memory_space<vmem>>, vector<64x16xf32>
    %c0_1 = arith.constant 0 : index
    %c0_2 = arith.constant 0 : index
    %1 = vector.load %arg1[%c0_1, %c0_2] : memref<16x512xf32, #tpu.memory_space<vmem>>, vector<16x512xf32>
    %cst = arith.constant dense<0.000000e+00> : vector<64x512xf32>
    %2 = tpu.matmul %0, %1, %cst {dimension_numbers = #tpu.dot_dimension_numbers<[1], [0], [0], [1], [0, 0, 1, 1], [], []>} : vector<64x16xf32>, vector<16x512xf32>, vector<64x512xf32> -> vector<64x512xf32>
    %c0_3 = arith.constant 0 : index
    %c0_4 = arith.constant 0 : index
    %3 = vector.load %arg3[%c0_3, %c0_4] : memref<1x512xf32, #tpu.memory_space<vmem>>, vector<1x512xf32>
    %4 = vector.broadcast %3 : vector<1x512xf32> to vector<64x512xf32>
    %5 = arith.addf %2, %4 : vector<64x512xf32>
    %c0_5 = arith.constant 0 : index
    %c0_6 = arith.constant 0 : index
    %6 = vector.load %arg7[%c0_5, %c0_6] : memref<64x512xf32, #tpu.memory_space<vmem>>, vector<64x512xf32>
    tpu.vector_store %arg7[%c0_5, %c0_6], %5 {strides = array<i32>} : memref<64x512xf32, #tpu.memory_space<vmem>>, vector<64x512xf32>,
    %cst_7 = arith.constant 0.000000e+00 : f32
    %7 = vector.broadcast %cst_7 : f32 to vector<8x128xf32>
    %cst_8 = arith.constant 0.000000e+00 : f32
    %8 = vector.broadcast %cst_8 : f32 to vector<8x128xf32>
    %c0_9 = arith.constant 0 : index
    %c0_10 = arith.constant 0 : index
    %9 = vector.load %arg7[%c0_9, %c0_10] : memref<64x512xf32, #tpu.memory_space<vmem>>, vector<8x512xf32>
    %c0_11 = arith.constant 0 : index
    %c0_12 = arith.constant 0 : index
    %10 = vector.load %arg2[%c0_11, %c0_12] : memref<128x512xf32, #tpu.memory_space<vmem>>, vector<128x512xf32>
    %cst_13 = arith.constant dense<0.000000e+00> : vector<8x512xf32>
    %11 = tpu.matmul %7, %10, %cst_13 {dimension_numbers = #tpu.dot_dimension_numbers<[1], [0], [0], [1], [0, 0, 1, 1], [], []>} : vector<8x128xf32>, vector<128x512xf32>, vector<8x512xf32> -> vector<8x512xf32>
    %12 = arith.addf %9, %11 : vector<8x512xf32>
    %13 = vector.extract_strided_slice %12 {offsets = [0, 0], sizes = [8, 128], strides = [1, 1]} : vector<8x512xf32> to vector<8x128xf32>
    %14 = arith.negf %13 : vector<8x128xf32>
    %15 = math.exp %14 : vector<8x128xf32>
    %cst_14 = arith.constant 1.000000e+00 : f32
    %16 = vector.broadcast %cst_14 : f32 to vector<8x128xf32>
    %17 = arith.addf %16, %15 : vector<8x128xf32>
    %18 = arith.divf %16, %17 : vector<8x128xf32>
    %19 = vector.extract_strided_slice %12 {offsets = [0, 128], sizes = [8, 128], strides = [1, 1]} : vector<8x512xf32> to vector<8x128xf32>
    %20 = arith.negf %19 : vector<8x128xf32>
    %21 = math.exp %20 : vector<8x128xf32>
    %cst_15 = arith.constant 1.000000e+00 : f32
    %22 = vector.broadcast %cst_15 : f32 to vector<8x128xf32>
    %23 = arith.addf %22, %21 : vector<8x128xf32>
    %24 = arith.divf %22, %23 : vector<8x128xf32>
    %25 = vector.extract_strided_slice %12 {offsets = [0, 256], sizes = [8, 128], strides = [1, 1]} : vector<8x512xf32> to vector<8x128xf32>
    %26 = math.tanh %25 : vector<8x128xf32>
    %27 = vector.extract_strided_slice %12 {offsets = [0, 384], sizes = [8, 128], strides = [1, 1]} : vector<8x512xf32> to vector<8x128xf32>
    %28 = arith.negf %27 : vector<8x128xf32>
    %29 = math.exp %28 : vector<8x128xf32>
    %cst_16 = arith.constant 1.000000e+00 : f32
    %30 = vector.broadcast %cst_16 : f32 to vector<8x128xf32>
    %31 = arith.addf %30, %29 : vector<8x128xf32>
    %32 = arith.divf %30, %31 : vector<8x128xf32>
    %33 = arith.mulf %24, %8 : vector<8x128xf32>
    %34 = arith.mulf %18, %26 : vector<8x128xf32>
    %35 = arith.addf %33, %34 : vector<8x128xf32>
    %36 = math.tanh %35 : vector<8x128xf32>
    %37 = arith.mulf %32, %36 : vector<8x128xf32>
    %c8 = arith.constant 8 : index
    %c0_17 = arith.constant 0 : index
    %38 = vector.load %arg7[%c8, %c0_17] : memref<64x512xf32, #tpu.memory_space<vmem>>, vector<8x512xf32>
    %c0_18 = arith.constant 0 : index
    %c0_19 = arith.constant 0 : index
    %39 = vector.load %arg2[%c0_18, %c0_19] : memref<128x512xf32, #tpu.memory_space<vmem>>, vector<128x512xf32>
    %cst_20 = arith.constant dense<0.000000e+00> : vector<8x512xf32>
    %40 = tpu.matmul %37, %39, %cst_20 {dimension_numbers = #tpu.dot_dimension_numbers<[1], [0], [0], [1], [0, 0, 1, 1], [], []>} : vector<8x128xf32>, vector<128x512xf32>, vector<8x512xf32> -> vector<8x512xf32>
    %41 = arith.addf %38, %40 : vector<8x512xf32>
    %42 = vector.extract_strided_slice %41 {offsets = [0, 0], sizes = [8, 128], strides = [1, 1]} : vector<8x512xf32> to vector<8x128xf32>
    %43 = arith.negf %42 : vector<8x128xf32>
    %44 = math.exp %43 : vector<8x128xf32>
    %cst_21 = arith.constant 1.000000e+00 : f32
    %45 = vector.broadcast %cst_21 : f32 to vector<8x128xf32>
    %46 = arith.addf %45, %44 : vector<8x128xf32>
    %47 = arith.divf %45, %46 : vector<8x128xf32>
    %48 = vector.extract_strided_slice %41 {offsets = [0, 128], sizes = [8, 128], strides = [1, 1]} : vector<8x512xf32> to vector<8x128xf32>
    %49 = arith.negf %48 : vector<8x128xf32>
    %50 = math.exp %49 : vector<8x128xf32>
    %cst_22 = arith.constant 1.000000e+00 : f32
    %51 = vector.broadcast %cst_22 : f32 to vector<8x128xf32>
    %52 = arith.addf %51, %50 : vector<8x128xf32>
    %53 = arith.divf %51, %52 : vector<8x128xf32>
    %54 = vector.extract_strided_slice %41 {offsets = [0, 256], sizes = [8, 128], strides = [1, 1]} : vector<8x512xf32> to vector<8x128xf32>
    %55 = math.tanh %54 : vector<8x128xf32>
    %56 = vector.extract_strided_slice %41 {offsets = [0, 384], sizes = [8, 128], strides = [1, 1]} : vector<8x512xf32> to vector<8x128xf32>
    %57 = arith.negf %56 : vector<8x128xf32>
    %58 = math.exp %57 : vector<8x128xf32>
    %cst_23 = arith.constant 1.000000e+00 : f32
    %59 = vector.broadcast %cst_23 : f32 to vector<8x128xf32>
    %60 = arith.addf %59, %58 : vector<8x128xf32>
    %61 = arith.divf %59, %60 : vector<8x128xf32>
    %62 = arith.mulf %53, %35 : vector<8x128xf32>
    %63 = arith.mulf %47, %55 : vector<8x128xf32>
    %64 = arith.addf %62, %63 : vector<8x128xf32>
    %65 = math.tanh %64 : vector<8x128xf32>
    %66 = arith.mulf %61, %65 : vector<8x128xf32>
    %c16 = arith.constant 16 : index
    %c0_24 = arith.constant 0 : index
    %67 = vector.load %arg7[%c16, %c0_24] : memref<64x512xf32, #tpu.memory_space<vmem>>, vector<8x512xf32>
    %c0_25 = arith.constant 0 : index
    %c0_26 = arith.constant 0 : index
    %68 = vector.load %arg2[%c0_25, %c0_26] : memref<128x512xf32, #tpu.memory_space<vmem>>, vector<128x512xf32>
    %cst_27 = arith.constant dense<0.000000e+00> : vector<8x512xf32>
    %69 = tpu.matmul %66, %68, %cst_27 {dimension_numbers = #tpu.dot_dimension_numbers<[1], [0], [0], [1], [0, 0, 1, 1], [], []>} : vector<8x128xf32>, vector<128x512xf32>, vector<8x512xf32> -> vector<8x512xf32>
    %70 = arith.addf %67, %69 : vector<8x512xf32>
    %71 = vector.extract_strided_slice %70 {offsets = [0, 0], sizes = [8, 128], strides = [1, 1]} : vector<8x512xf32> to vector<8x128xf32>
    %72 = arith.negf %71 : vector<8x128xf32>
    %73 = math.exp %72 : vector<8x128xf32>
    %cst_28 = arith.constant 1.000000e+00 : f32
    %74 = vector.broadcast %cst_28 : f32 to vector<8x128xf32>
    %75 = arith.addf %74, %73 : vector<8x128xf32>
    %76 = arith.divf %74, %75 : vector<8x128xf32>
    %77 = vector.extract_strided_slice %70 {offsets = [0, 128], sizes = [8, 128], strides = [1, 1]} : vector<8x512xf32> to vector<8x128xf32>
    %78 = arith.negf %77 : vector<8x128xf32>
    %79 = math.exp %78 : vector<8x128xf32>
    %cst_29 = arith.constant 1.000000e+00 : f32
    %80 = vector.broadcast %cst_29 : f32 to vector<8x128xf32>
    %81 = arith.addf %80, %79 : vector<8x128xf32>
    %82 = arith.divf %80, %81 : vector<8x128xf32>
    %83 = vector.extract_strided_slice %70 {offsets = [0, 256], sizes = [8, 128], strides = [1, 1]} : vector<8x512xf32> to vector<8x128xf32>
    %84 = math.tanh %83 : vector<8x128xf32>
    %85 = vector.extract_strided_slice %70 {offsets = [0, 384], sizes = [8, 128], strides = [1, 1]} : vector<8x512xf32> to vector<8x128xf32>
    %86 = arith.negf %85 : vector<8x128xf32>
    %87 = math.exp %86 : vector<8x128xf32>
    %cst_30 = arith.constant 1.000000e+00 : f32
    %88 = vector.broadcast %cst_30 : f32 to vector<8x128xf32>
    %89 = arith.addf %88, %87 : vector<8x128xf32>
    %90 = arith.divf %88, %89 : vector<8x128xf32>
    %91 = arith.mulf %82, %64 : vector<8x128xf32>
    %92 = arith.mulf %76, %84 : vector<8x128xf32>
    %93 = arith.addf %91, %92 : vector<8x128xf32>
    %94 = math.tanh %93 : vector<8x128xf32>
    %95 = arith.mulf %90, %94 : vector<8x128xf32>
    %c24 = arith.constant 24 : index
    %c0_31 = arith.constant 0 : index
    %96 = vector.load %arg7[%c24, %c0_31] : memref<64x512xf32, #tpu.memory_space<vmem>>, vector<8x512xf32>
    %c0_32 = arith.constant 0 : index
    %c0_33 = arith.constant 0 : index
    %97 = vector.load %arg2[%c0_32, %c0_33] : memref<128x512xf32, #tpu.memory_space<vmem>>, vector<128x512xf32>
    %cst_34 = arith.constant dense<0.000000e+00> : vector<8x512xf32>
    %98 = tpu.matmul %95, %97, %cst_34 {dimension_numbers = #tpu.dot_dimension_numbers<[1], [0], [0], [1], [0, 0, 1, 1], [], []>} : vector<8x128xf32>, vector<128x512xf32>, vector<8x512xf32> -> vector<8x512xf32>
    %99 = arith.addf %96, %98 : vector<8x512xf32>
    %100 = vector.extract_strided_slice %99 {offsets = [0, 0], sizes = [8, 128], strides = [1, 1]} : vector<8x512xf32> to vector<8x128xf32>
    %101 = arith.negf %100 : vector<8x128xf32>
    %102 = math.exp %101 : vector<8x128xf32>
    %cst_35 = arith.constant 1.000000e+00 : f32
    %103 = vector.broadcast %cst_35 : f32 to vector<8x128xf32>
    %104 = arith.addf %103, %102 : vector<8x128xf32>
    %105 = arith.divf %103, %104 : vector<8x128xf32>
    %106 = vector.extract_strided_slice %99 {offsets = [0, 128], sizes = [8, 128], strides = [1, 1]} : vector<8x512xf32> to vector<8x128xf32>
    %107 = arith.negf %106 : vector<8x128xf32>
    %108 = math.exp %107 : vector<8x128xf32>
    %cst_36 = arith.constant 1.000000e+00 : f32
    %109 = vector.broadcast %cst_36 : f32 to vector<8x128xf32>
    %110 = arith.addf %109, %108 : vector<8x128xf32>
    %111 = arith.divf %109, %110 : vector<8x128xf32>
    %112 = vector.extract_strided_slice %99 {offsets = [0, 256], sizes = [8, 128], strides = [1, 1]} : vector<8x512xf32> to vector<8x128xf32>
    %113 = math.tanh %112 : vector<8x128xf32>
    %114 = vector.extract_strided_slice %99 {offsets = [0, 384], sizes = [8, 128], strides = [1, 1]} : vector<8x512xf32> to vector<8x128xf32>
    %115 = arith.negf %114 : vector<8x128xf32>
    %116 = math.exp %115 : vector<8x128xf32>
    %cst_37 = arith.constant 1.000000e+00 : f32
    %117 = vector.broadcast %cst_37 : f32 to vector<8x128xf32>
    %118 = arith.addf %117, %116 : vector<8x128xf32>
    %119 = arith.divf %117, %118 : vector<8x128xf32>
    %120 = arith.mulf %111, %93 : vector<8x128xf32>
    %121 = arith.mulf %105, %113 : vector<8x128xf32>
    %122 = arith.addf %120, %121 : vector<8x128xf32>
    %123 = math.tanh %122 : vector<8x128xf32>
    %124 = arith.mulf %119, %123 : vector<8x128xf32>
    %c32 = arith.constant 32 : index
    %c0_38 = arith.constant 0 : index
    %125 = vector.load %arg7[%c32, %c0_38] : memref<64x512xf32, #tpu.memory_space<vmem>>, vector<8x512xf32>
    %c0_39 = arith.constant 0 : index
    %c0_40 = arith.constant 0 : index
    %126 = vector.load %arg2[%c0_39, %c0_40] : memref<128x512xf32, #tpu.memory_space<vmem>>, vector<128x512xf32>
    %cst_41 = arith.constant dense<0.000000e+00> : vector<8x512xf32>
    %127 = tpu.matmul %124, %126, %cst_41 {dimension_numbers = #tpu.dot_dimension_numbers<[1], [0], [0], [1], [0, 0, 1, 1], [], []>} : vector<8x128xf32>, vector<128x512xf32>, vector<8x512xf32> -> vector<8x512xf32>
    %128 = arith.addf %125, %127 : vector<8x512xf32>
    %129 = vector.extract_strided_slice %128 {offsets = [0, 0], sizes = [8, 128], strides = [1, 1]} : vector<8x512xf32> to vector<8x128xf32>
    %130 = arith.negf %129 : vector<8x128xf32>
    %131 = math.exp %130 : vector<8x128xf32>
    %cst_42 = arith.constant 1.000000e+00 : f32
    %132 = vector.broadcast %cst_42 : f32 to vector<8x128xf32>
    %133 = arith.addf %132, %131 : vector<8x128xf32>
    %134 = arith.divf %132, %133 : vector<8x128xf32>
    %135 = vector.extract_strided_slice %128 {offsets = [0, 128], sizes = [8, 128], strides = [1, 1]} : vector<8x512xf32> to vector<8x128xf32>
    %136 = arith.negf %135 : vector<8x128xf32>
    %137 = math.exp %136 : vector<8x128xf32>
    %cst_43 = arith.constant 1.000000e+00 : f32
    %138 = vector.broadcast %cst_43 : f32 to vector<8x128xf32>
    %139 = arith.addf %138, %137 : vector<8x128xf32>
    %140 = arith.divf %138, %139 : vector<8x128xf32>
    %141 = vector.extract_strided_slice %128 {offsets = [0, 256], sizes = [8, 128], strides = [1, 1]} : vector<8x512xf32> to vector<8x128xf32>
    %142 = math.tanh %141 : vector<8x128xf32>
    %143 = vector.extract_strided_slice %128 {offsets = [0, 384], sizes = [8, 128], strides = [1, 1]} : vector<8x512xf32> to vector<8x128xf32>
    %144 = arith.negf %143 : vector<8x128xf32>
    %145 = math.exp %144 : vector<8x128xf32>
    %cst_44 = arith.constant 1.000000e+00 : f32
    %146 = vector.broadcast %cst_44 : f32 to vector<8x128xf32>
    %147 = arith.addf %146, %145 : vector<8x128xf32>
    %148 = arith.divf %146, %147 : vector<8x128xf32>
    %149 = arith.mulf %140, %122 : vector<8x128xf32>
    %150 = arith.mulf %134, %142 : vector<8x128xf32>
    %151 = arith.addf %149, %150 : vector<8x128xf32>
    %152 = math.tanh %151 : vector<8x128xf32>
    %153 = arith.mulf %148, %152 : vector<8x128xf32>
    %c40 = arith.constant 40 : index
    %c0_45 = arith.constant 0 : index
    %154 = vector.load %arg7[%c40, %c0_45] : memref<64x512xf32, #tpu.memory_space<vmem>>, vector<8x512xf32>
    %c0_46 = arith.constant 0 : index
    %c0_47 = arith.constant 0 : index
    %155 = vector.load %arg2[%c0_46, %c0_47] : memref<128x512xf32, #tpu.memory_space<vmem>>, vector<128x512xf32>
    %cst_48 = arith.constant dense<0.000000e+00> : vector<8x512xf32>
    %156 = tpu.matmul %153, %155, %cst_48 {dimension_numbers = #tpu.dot_dimension_numbers<[1], [0], [0], [1], [0, 0, 1, 1], [], []>} : vector<8x128xf32>, vector<128x512xf32>, vector<8x512xf32> -> vector<8x512xf32>
    %157 = arith.addf %154, %156 : vector<8x512xf32>
    %158 = vector.extract_strided_slice %157 {offsets = [0, 0], sizes = [8, 128], strides = [1, 1]} : vector<8x512xf32> to vector<8x128xf32>
    %159 = arith.negf %158 : vector<8x128xf32>
    %160 = math.exp %159 : vector<8x128xf32>
    %cst_49 = arith.constant 1.000000e+00 : f32
    %161 = vector.broadcast %cst_49 : f32 to vector<8x128xf32>
    %162 = arith.addf %161, %160 : vector<8x128xf32>
    %163 = arith.divf %161, %162 : vector<8x128xf32>
    %164 = vector.extract_strided_slice %157 {offsets = [0, 128], sizes = [8, 128], strides = [1, 1]} : vector<8x512xf32> to vector<8x128xf32>
    %165 = arith.negf %164 : vector<8x128xf32>
    %166 = math.exp %165 : vector<8x128xf32>
    %cst_50 = arith.constant 1.000000e+00 : f32
    %167 = vector.broadcast %cst_50 : f32 to vector<8x128xf32>
    %168 = arith.addf %167, %166 : vector<8x128xf32>
    %169 = arith.divf %167, %168 : vector<8x128xf32>
    %170 = vector.extract_strided_slice %157 {offsets = [0, 256], sizes = [8, 128], strides = [1, 1]} : vector<8x512xf32> to vector<8x128xf32>
    %171 = math.tanh %170 : vector<8x128xf32>
    %172 = vector.extract_strided_slice %157 {offsets = [0, 384], sizes = [8, 128], strides = [1, 1]} : vector<8x512xf32> to vector<8x128xf32>
    %173 = arith.negf %172 : vector<8x128xf32>
    %174 = math.exp %173 : vector<8x128xf32>
    %cst_51 = arith.constant 1.000000e+00 : f32
    %175 = vector.broadcast %cst_51 : f32 to vector<8x128xf32>
    %176 = arith.addf %175, %174 : vector<8x128xf32>
    %177 = arith.divf %175, %176 : vector<8x128xf32>
    %178 = arith.mulf %169, %151 : vector<8x128xf32>
    %179 = arith.mulf %163, %171 : vector<8x128xf32>
    %180 = arith.addf %178, %179 : vector<8x128xf32>
    %181 = math.tanh %180 : vector<8x128xf32>
    %182 = arith.mulf %177, %181 : vector<8x128xf32>
    %c48 = arith.constant 48 : index
    %c0_52 = arith.constant 0 : index
    %183 = vector.load %arg7[%c48, %c0_52] : memref<64x512xf32, #tpu.memory_space<vmem>>, vector<8x512xf32>
    %c0_53 = arith.constant 0 : index
    %c0_54 = arith.constant 0 : index
    %184 = vector.load %arg2[%c0_53, %c0_54] : memref<128x512xf32, #tpu.memory_space<vmem>>, vector<128x512xf32>
    %cst_55 = arith.constant dense<0.000000e+00> : vector<8x512xf32>
    %185 = tpu.matmul %182, %184, %cst_55 {dimension_numbers = #tpu.dot_dimension_numbers<[1], [0], [0], [1], [0, 0, 1, 1], [], []>} : vector<8x128xf32>, vector<128x512xf32>, vector<8x512xf32> -> vector<8x512xf32>
    %186 = arith.addf %183, %185 : vector<8x512xf32>
    %187 = vector.extract_strided_slice %186 {offsets = [0, 0], sizes = [8, 128], strides = [1, 1]} : vector<8x512xf32> to vector<8x128xf32>
    %188 = arith.negf %187 : vector<8x128xf32>
    %189 = math.exp %188 : vector<8x128xf32>
    %cst_56 = arith.constant 1.000000e+00 : f32
    %190 = vector.broadcast %cst_56 : f32 to vector<8x128xf32>
    %191 = arith.addf %190, %189 : vector<8x128xf32>
    %192 = arith.divf %190, %191 : vector<8x128xf32>
    %193 = vector.extract_strided_slice %186 {offsets = [0, 128], sizes = [8, 128], strides = [1, 1]} : vector<8x512xf32> to vector<8x128xf32>
    %194 = arith.negf %193 : vector<8x128xf32>
    %195 = math.exp %194 : vector<8x128xf32>
    %cst_57 = arith.constant 1.000000e+00 : f32
    %196 = vector.broadcast %cst_57 : f32 to vector<8x128xf32>
    %197 = arith.addf %196, %195 : vector<8x128xf32>
    %198 = arith.divf %196, %197 : vector<8x128xf32>
    %199 = vector.extract_strided_slice %186 {offsets = [0, 256], sizes = [8, 128], strides = [1, 1]} : vector<8x512xf32> to vector<8x128xf32>
    %200 = math.tanh %199 : vector<8x128xf32>
    %201 = vector.extract_strided_slice %186 {offsets = [0, 384], sizes = [8, 128], strides = [1, 1]} : vector<8x512xf32> to vector<8x128xf32>
    %202 = arith.negf %201 : vector<8x128xf32>
    %203 = math.exp %202 : vector<8x128xf32>
    %cst_58 = arith.constant 1.000000e+00 : f32
    %204 = vector.broadcast %cst_58 : f32 to vector<8x128xf32>
    %205 = arith.addf %204, %203 : vector<8x128xf32>
    %206 = arith.divf %204, %205 : vector<8x128xf32>
    %207 = arith.mulf %198, %180 : vector<8x128xf32>
    %208 = arith.mulf %192, %200 : vector<8x128xf32>
    %209 = arith.addf %207, %208 : vector<8x128xf32>
    %210 = math.tanh %209 : vector<8x128xf32>
    %211 = arith.mulf %206, %210 : vector<8x128xf32>
    %c56 = arith.constant 56 : index
    %c0_59 = arith.constant 0 : index
    %212 = vector.load %arg7[%c56, %c0_59] : memref<64x512xf32, #tpu.memory_space<vmem>>, vector<8x512xf32>
    %c0_60 = arith.constant 0 : index
    %c0_61 = arith.constant 0 : index
    %213 = vector.load %arg2[%c0_60, %c0_61] : memref<128x512xf32, #tpu.memory_space<vmem>>, vector<128x512xf32>
    %cst_62 = arith.constant dense<0.000000e+00> : vector<8x512xf32>
    %214 = tpu.matmul %211, %213, %cst_62 {dimension_numbers = #tpu.dot_dimension_numbers<[1], [0], [0], [1], [0, 0, 1, 1], [], []>} : vector<8x128xf32>, vector<128x512xf32>, vector<8x512xf32> -> vector<8x512xf32>
    %215 = arith.addf %212, %214 : vector<8x512xf32>
    %216 = vector.extract_strided_slice %215 {offsets = [0, 0], sizes = [8, 128], strides = [1, 1]} : vector<8x512xf32> to vector<8x128xf32>
    %217 = arith.negf %216 : vector<8x128xf32>
    %218 = math.exp %217 : vector<8x128xf32>
    %cst_63 = arith.constant 1.000000e+00 : f32
    %219 = vector.broadcast %cst_63 : f32 to vector<8x128xf32>
    %220 = arith.addf %219, %218 : vector<8x128xf32>
    %221 = arith.divf %219, %220 : vector<8x128xf32>
    %222 = vector.extract_strided_slice %215 {offsets = [0, 128], sizes = [8, 128], strides = [1, 1]} : vector<8x512xf32> to vector<8x128xf32>
    %223 = arith.negf %222 : vector<8x128xf32>
    %224 = math.exp %223 : vector<8x128xf32>
    %cst_64 = arith.constant 1.000000e+00 : f32
    %225 = vector.broadcast %cst_64 : f32 to vector<8x128xf32>
    %226 = arith.addf %225, %224 : vector<8x128xf32>
    %227 = arith.divf %225, %226 : vector<8x128xf32>
    %228 = vector.extract_strided_slice %215 {offsets = [0, 256], sizes = [8, 128], strides = [1, 1]} : vector<8x512xf32> to vector<8x128xf32>
    %229 = math.tanh %228 : vector<8x128xf32>
    %230 = vector.extract_strided_slice %215 {offsets = [0, 384], sizes = [8, 128], strides = [1, 1]} : vector<8x512xf32> to vector<8x128xf32>
    %231 = arith.negf %230 : vector<8x128xf32>
    %232 = math.exp %231 : vector<8x128xf32>
    %cst_65 = arith.constant 1.000000e+00 : f32
    %233 = vector.broadcast %cst_65 : f32 to vector<8x128xf32>
    %234 = arith.addf %233, %232 : vector<8x128xf32>
    %235 = arith.divf %233, %234 : vector<8x128xf32>
    %236 = arith.mulf %227, %209 : vector<8x128xf32>
    %237 = arith.mulf %221, %229 : vector<8x128xf32>
    %238 = arith.addf %236, %237 : vector<8x128xf32>
    %239 = math.tanh %238 : vector<8x128xf32>
    %240 = arith.mulf %235, %239 : vector<8x128xf32>
    %c0_66 = arith.constant 0 : index
    %c0_67 = arith.constant 0 : index
    %241 = vector.load %arg4[%c0_66, %c0_67] : memref<128x128xf32, #tpu.memory_space<vmem>>, vector<128x128xf32>
    %cst_68 = arith.constant dense<0.000000e+00> : vector<8x128xf32>
    %242 = tpu.matmul %240, %241, %cst_68 {dimension_numbers = #tpu.dot_dimension_numbers<[1], [0], [0], [1], [0, 0, 1, 1], [], []>} : vector<8x128xf32>, vector<128x128xf32>, vector<8x128xf32> -> vector<8x128xf32>
    %c0_69 = arith.constant 0 : index
    %c0_70 = arith.constant 0 : index
    %243 = vector.load %arg5[%c0_69, %c0_70] : memref<1x128xf32, #tpu.memory_space<vmem>>, vector<1x128xf32>
    %244 = vector.broadcast %243 : vector<1x128xf32> to vector<8x128xf32>
    %245 = arith.addf %242, %244 : vector<8x128xf32>
    %c0_71 = arith.constant 0 : index
    %c0_72 = arith.constant 0 : index
    %246 = vector.load %arg6[%c0_71, %c0_72] : memref<8x128xf32, #tpu.memory_space<vmem>>, vector<8x128xf32>
    tpu.vector_store %arg6[%c0_71, %c0_72], %245 {strides = array<i32>} : memref<8x128xf32, #tpu.memory_space<vmem>>, vector<8x128xf32>,
    return
  }
}

</mosaic_0001>

<bundles_post_ra>
// kernel: tpu_custom_call.1
= control target key start
LH: loop header
LB: loop body
LE: loop exit
PB: predicated region body
PF: predicated region fallthrough
CT: control target
= control target key end

     0   :  { %11 = vsyncpa [#allocation4], 0  ;;  %s3424_s0 = inlined_call_operand.vmem [shape: f32[64,16], index: 0, kind: input, shape index: {}]   ;;  %s3425_s1 = inlined_call_operand.vmem [shape: f32[16,512], index: 1, kind: input, shape index: {}]   ;;  %s3426_s2 = inlined_call_operand.hbm [shape: f32[128,512], index: 2, kind: input, shape index: {}]   ;;  %s3427_s3 = inlined_call_operand.vmem [shape: f32[1,512], index: 3, kind: input, shape index: {}]   ;;  %s3428_s4 = inlined_call_operand.hbm [shape: f32[128,128], index: 4, kind: input, shape index: {}]   ;;  %s3429_s5 = inlined_call_operand.vmem [shape: f32[1,128], index: 5, kind: input, shape index: {}]   ;;  %s3430_s6 = inlined_call_operand.hbm [shape: f32[8,128], index: 6, kind: output, shape index: {}]  }
   0x1   :  { %12 = vsyncpa [#allocation7], 0 }
   0x2   :  { %13 = vsyncpa [#allocation5], 0  ;;  %s2850_s21 = smov [#allocation3]   ;;  %s2778_s25 = scalar_lea.hbm %s3426_s2, 8192 }
   0x3   :  { %s23_s22 = sshll.u32 %s2850_s21, 4  ;;  %p2779_p0 = scmp.ne.s32.totalorder %s3426_s2, %s2778_s25  ;;  %s24_s22 = int_to_ptr.vmem [resolvable:$true] %s23_s22 }
   0x4   :  { %p2782_p1 = scmp.lt.u32.totalorder %s2778_s25, %s3426_s2 }
   0x6   :  { %p2784_p2 = pnand %p2782_p1, %p2779_p0 }
   0x8   :  { %2787 = shalt.err (!%p2784_p2)
}
   0x9   :  { %s2788_s30 = scalar_lea.vmem %s24_s22, 8192  ;;  %p2793_p4 = scmp.lt.s32.totalorder %s24_s22, %s24_s22 }
   0xa   :  { %p2789_p3 = scmp.ne.s32.totalorder %s24_s22, %s2788_s30  ;;  %p2794_p5 = scmp.lt.s32.totalorder %s2788_s30, %s2788_s30 }
   0xc   :  { %p2795_p6 = por %p2794_p5, %p2793_p4 }
   0xe   :  { %p2796_p7 = pnand %p2795_p6, %p2789_p3 }
  0x10   :  { %2799 = shalt.err (!%p2796_p7)
}
  0x11   :  { %s2851_s7 = smov 512   ;;  %s2852_s8 = smov 32  }
  0x12   :  { %29 = dma.hbm_to_vmem [thread:$0]  %s3426_s2, 8192, %s24_s22, [#allocation4], %s2851_s7, %s2851_s7, %s2852_s8  }
  0x13   :  { %s2853_s11 = smov [#allocation6]   ;;  %s2800_s15 = scalar_lea.hbm %s3428_s4, 2048 }
  0x14   :  { %s37_s12 = sshll.u32 %s2853_s11, 4  ;;  %p2801_p8 = scmp.ne.s32.totalorder %s3428_s4, %s2800_s15  ;;  %s38_s12 = int_to_ptr.vmem [resolvable:$true] %s37_s12 }
  0x15   :  { %p2804_p9 = scmp.lt.u32.totalorder %s2800_s15, %s3428_s4 }
  0x17   :  { %p2806_p10 = pnand %p2804_p9, %p2801_p8 }
  0x19   :  { %2809 = shalt.err (!%p2806_p10)
}
  0x1a   :  { %s2810_s20 = scalar_lea.vmem %s38_s12, 2048  ;;  %p2815_p12 = scmp.lt.s32.totalorder %s38_s12, %s38_s12 }
  0x1b   :  { %p2811_p11 = scmp.ne.s32.totalorder %s38_s12, %s2810_s20  ;;  %p2816_p13 = scmp.lt.s32.totalorder %s2810_s20, %s2810_s20 }
  0x1d   :  { %p2817_p0 = por %p2816_p13, %p2815_p12 }
  0x1f   :  { %p2818_p1 = pnand %p2817_p0, %p2811_p11 }
  0x21   :  { %2821 = shalt.err (!%p2818_p1)
}
  0x22   :  { %s2854_s2 = smov 128   ;;  %s2855_s21 = smov 8  }
  0x23   :  { %43 = dma.hbm_to_vmem [thread:$0]  %s3428_s4, 2048, %s38_s12, [#allocation7], %s2854_s2, %s2854_s2, %s2855_s21  }
  0x24   :  { %2844 = dma.done.wait [#allocation4], 8192  }
  0x25   :  { %2845 = vsyncadd [#allocation4], 4294959104 }
  0x26   :  { %2846 = dma.done.wait [#allocation7], 2048  }
  0x27   :  { %2847 = vsyncadd [#allocation7], 4294965248  ;;  %v2856_v0 = vmov 0.0   ;;  %v61_v1 = vld [vmem:[%s3425_s1 + $0x8] sm:$0xff]  ;;  %v63_v3 = vld [vmem:[%s3425_s1 + $0x18] sm:$0xff]  ;;  %vm90_vm0 = vcmask 130048  }
  0x28   :  { %179 = vmatprep.mubr.f32.mxu0 %v2856_v0  ;;  %292 = vmatprep.mubr.f32.mxu1 %v2856_v0  ;;  %v65_v2 = vld [vmem:[%s3425_s1 + $0x28] sm:$0xff]  ;;  %v67_v5 = vld [vmem:[%s3425_s1 + $0x38] sm:$0xff]  ;;  %v60_v6 = vld [vmem:[%s3425_s1] sm:$0xff]  ;;  %vm2858_vm1 = vmmov 0   ;;  %s2859_s30 = smov [#allocation8]  }
  0x29   :  { %v2032_v4 = vpack.c.bf16 %v65_v2, %v61_v1  ;;  %v64_v7 = vld [vmem:[%s3425_s1 + $0x20] sm:$0xff]  ;;  %v2036_v8 = vpack.c.bf16 %v67_v5, %v63_v3  ;;  %v62_v10 = vld [vmem:[%s3425_s1 + $0x10] sm:$0xff]  ;;  %v378_v14 = vld [vmem:[#allocation3 + $0x8] sm:$0xff]  ;;  %s1929_s7 = sshll.u32 %s2859_s30, 4  ;;  %s1930_s7 = int_to_ptr.vmem [resolvable:$true] %s1929_s7 }
  0x2a   :  { %v2034_v9 = vpack.c.bf16 %v64_v7, %v60_v6  ;;  %v66_v11 = vld [vmem:[%s3425_s1 + $0x30] sm:$0xff]  ;;  %v52_v12 = vld [vmem:[%s3424_s0] sm:$0xff]  ;;  %v382_v15 = vld [vmem:[#allocation3 + $0x28] sm:$0xff]  ;;  %s2822_s8 = scalar_lea.vmem %s1930_s7, 128  ;;  %p2827_p3 = scmp.lt.s32.totalorder %s1930_s7, %s1930_s7 }
  0x2b   :  { %2033 = vmatprep.subr.bf16.mxu0 %v2032_v4  ;;  %v2038_v13 = vpack.c.bf16 %v66_v11, %v62_v10  ;;  %v380_v16 = vld [vmem:[#allocation3 + $0x18] sm:$0xff]  ;;  %2037 = vmatprep.subr.bf16.mxu1 %v2036_v8  ;;  %v2948_v17 = vpack.c.bf16 %v382_v15, %v378_v14  ;;  %v377_v19 = vld [vmem:[#allocation3] sm:$0xff]  ;;  %v379_v23 = vld [vmem:[#allocation3 + $0x10] sm:$0xff]  ;;  %p2823_p2 = scmp.ne.s32.totalorder %s1930_s7, %s2822_s8  ;;  %p2828_p4 = scmp.lt.s32.totalorder %s2822_s8, %s2822_s8 }
  0x2c   :  { %2035 = vmatpush1.bf16.msra.mxu0 %v2034_v9  ;;  %v384_v18 = vld [vmem:[#allocation3 + $0x38] sm:$0xff]  ;;  %v381_v20 = vld [vmem:[#allocation3 + $0x20] sm:$0xff]  ;;  %v383_v24 = vld [vmem:[#allocation3 + $0x30] sm:$0xff] }
  0x2d   :  { %2039 = vmatpush1.bf16.msra.mxu1 %v2038_v13  ;;  %v2950_v21 = vpack.c.bf16 %v384_v18, %v380_v16  ;;  %v2952_v22 = vpack.c.bf16 %v381_v20, %v377_v19  ;;  %2041 = vmatprep.subr.bf16.mxu0 %v2948_v17  ;;  %v2955_v25 = vpack.c.bf16 %v383_v24, %v379_v23  ;;  %v386_v26 = vld [vmem:[#allocation3 + $0x48] sm:$0xff]  ;;  %v388_v28 = vld [vmem:[#allocation3 + $0x58] sm:$0xff]  ;;  %v385_v31 = vld [vmem:[#allocation3 + $0x40] sm:$0xff]  ;;  %p2829_p5 = por %p2828_p4, %p2827_p3 }
  0x2e   :  { %v390_v27 = vld [vmem:[#allocation3 + $0x68] sm:$0xff]  ;;  %v392_v30 = vld [vmem:[#allocation3 + $0x78] sm:$0xff]  ;;  %v389_v32 = vld [vmem:[#allocation3 + $0x60] sm:$0xff] }
  0x2f   :  { %1939 = vmatmul.mubr.msk.f32.vlgmr.msra.gmra.mrb[0].mxu0 %vm90_vm0, %v52_v12  ;;  %2073 = vmatprep.subr.bf16.mxu1 %v2950_v21  ;;  %v2959_v29 = vpack.c.bf16 %v390_v27, %v386_v26  ;;  %v53_v33 = vld [vmem:[%s3424_s0 + $0x8] sm:$0xff]  ;;  %v2966_v34 = vpack.c.bf16 %v392_v30, %v388_v28  ;;  %v2968_v35 = vpack.c.bf16 %v389_v32, %v385_v31  ;;  %v387_v36 = vld [vmem:[#allocation3 + $0x50] sm:$0xff]  ;;  %v396_v41 = vld [vmem:[#allocation3 + $0x98] sm:$0xff]  ;;  %p2830_p6 = pnand %p2829_p5, %p2823_p2 }
  0x30   :  { %1947 = vmatmul.mubr.msk.f32.vlgmr.msra.gmra.mrb[0].mxu1 %vm90_vm0, %v52_v12  ;;  %2043 = vmatpush1.bf16.msra.mxu0 %v2952_v22  ;;  %v391_v37 = vld [vmem:[#allocation3 + $0x70] sm:$0xff]  ;;  %v394_v39 = vld [vmem:[#allocation3 + $0x88] sm:$0xff]  ;;  %v400_v43 = vld [vmem:[#allocation3 + $0xb8] sm:$0xff] }
  0x31   :  { %2075 = vmatpush1.bf16.msra.mxu1 %v2955_v25  ;;  %185 = vmatprep.mubr.f32.mxu0 %v2856_v0  ;;  %v2972_v38 = vpack.c.bf16 %v391_v37, %v387_v36  ;;  %v398_v40 = vld [vmem:[#allocation3 + $0xa8] sm:$0xff]  ;;  %v393_v44 = vld [vmem:[#allocation3 + $0x80] sm:$0xff]  ;;  %v54_v46 = vld [vmem:[%s3424_s0 + $0x10] sm:$0xff]  ;;  %v2983_v47 = vpack.c.bf16 %v400_v43, %v396_v41 }
  0x32   :  { %298 = vmatprep.mubr.f32.mxu1 %v2856_v0  ;;  %2045 = vmatprep.subr.bf16.mxu0 %v2959_v29  ;;  %v2976_v42 = vpack.c.bf16 %v398_v40, %v394_v39  ;;  %v397_v45 = vld [vmem:[#allocation3 + $0xa0] sm:$0xff]  ;;  %v395_v48 = vld [vmem:[#allocation3 + $0x90] sm:$0xff]  ;;  %v402_v51 = vld [vmem:[#allocation3 + $0xc8] sm:$0xff] }
  0x33   :  { %1940 = vmatmul.mubr.msk.f32.gmra.mrb[2].mxu0 %vm90_vm0, %v53_v33  ;;  %2077 = vmatprep.subr.bf16.mxu1 %v2966_v34  ;;  %v399_v49 = vld [vmem:[#allocation3 + $0xb0] sm:$0xff]  ;;  %v2987_v50 = vpack.c.bf16 %v397_v45, %v393_v44  ;;  %v406_v52 = vld [vmem:[#allocation3 + $0xe8] sm:$0xff]  ;;  %v404_v53 = vld [vmem:[#allocation3 + $0xd8] sm:$0xff] }
  0x34   :  { %1948 = vmatmul.mubr.msk.f32.gmra.mrb[2].mxu1 %vm90_vm0, %v53_v33  ;;  %2047 = vmatpush1.bf16.msra.mxu0 %v2968_v35  ;;  %v2991_v54 = vpack.c.bf16 %v399_v49, %v395_v48  ;;  %v408_v55 = vld [vmem:[#allocation3 + $0xf8] sm:$0xff]  ;;  %v401_v56 = vld [vmem:[#allocation3 + $0xc0] sm:$0xff]  ;;  %v2995_v58 = vpack.c.bf16 %v406_v52, %v402_v51  ;;  %v403_v59 = vld [vmem:[#allocation3 + $0xd0] sm:$0xff] }
  0x35   :  { %2079 = vmatpush1.bf16.msra.mxu1 %v2972_v38  ;;  %191 = vmatprep.mubr.f32.mxu0 %v2856_v0  ;;  %v405_v57 = vld [vmem:[#allocation3 + $0xe0] sm:$0xff]  ;;  %v407_v60 = vld [vmem:[#allocation3 + $0xf0] sm:$0xff]  ;;  %v2999_v61 = vpack.c.bf16 %v408_v55, %v404_v53  ;;  %v410_v62 = vld [vmem:[#allocation3 + $0x108] sm:$0xff] }
  0x36   :  { %304 = vmatprep.mubr.f32.mxu1 %v2856_v0  ;;  %2049 = vmatprep.subr.bf16.mxu0 %v2976_v42  ;;  %v414_v63 = vld [vmem:[#allocation3 + $0x128] sm:$0xff]  ;;  %v55_v1 = vld [vmem:[%s3424_s0 + $0x18] sm:$0xff]  ;;  %v3006_v2 = vpack.c.bf16 %v405_v57, %v401_v56  ;;  %v3010_v5 = vpack.c.bf16 %v407_v60, %v403_v59  ;;  %v409_v6 = vld [vmem:[#allocation3 + $0x100] sm:$0xff] }
  0x37   :  { %1941 = vmatmul.mubr.msk.f32.gmra.mrb[4].mxu0 %vm90_vm0, %v54_v46  ;;  %2081 = vmatprep.subr.bf16.mxu1 %v2983_v47  ;;  %v412_v3 = vld [vmem:[#allocation3 + $0x118] sm:$0xff]  ;;  %v413_v7 = vld [vmem:[#allocation3 + $0x120] sm:$0xff]  ;;  %v3014_v8 = vpack.c.bf16 %v414_v63, %v410_v62  ;;  %v411_v9 = vld [vmem:[#allocation3 + $0x110] sm:$0xff] }
  0x38   :  { %1949 = vmatmul.mubr.msk.f32.gmra.mrb[4].mxu1 %vm90_vm0, %v54_v46  ;;  %2051 = vmatpush1.bf16.msra.mxu0 %v2987_v50  ;;  %v416_v4 = vld [vmem:[#allocation3 + $0x138] sm:$0xff]  ;;  %v415_v10 = vld [vmem:[#allocation3 + $0x130] sm:$0xff]  ;;  %v418_v12 = vld [vmem:[#allocation3 + $0x148] sm:$0xff]  ;;  %v3025_v15 = vpack.c.bf16 %v413_v7, %v409_v6  ;;  %v70_v7 = vlaneseq }
  0x39   :  { %2083 = vmatpush1.bf16.msra.mxu1 %v2991_v54  ;;  %197 = vmatprep.mubr.f32.mxu0 %v2856_v0  ;;  %v3018_v11 = vpack.c.bf16 %v416_v4, %v412_v3  ;;  %v422_v13 = vld [vmem:[#allocation3 + $0x168] sm:$0xff]  ;;  %v56_v14 = vld [vmem:[%s3424_s0 + $0x20] sm:$0xff]  ;;  %v420_v16 = vld [vmem:[#allocation3 + $0x158] sm:$0xff]  ;;  %v3029_v19 = vpack.c.bf16 %v415_v10, %v411_v9 }
  0x3a   :  { %310 = vmatprep.mubr.f32.mxu1 %v2856_v0  ;;  %2053 = vmatprep.subr.bf16.mxu0 %v2995_v58  ;;  %v424_v18 = vld [vmem:[#allocation3 + $0x178] sm:$0xff]  ;;  %v417_v20 = vld [vmem:[#allocation3 + $0x140] sm:$0xff]  ;;  %v3033_v24 = vpack.c.bf16 %v422_v13, %v418_v12  ;;  %v419_v26 = vld [vmem:[#allocation3 + $0x150] sm:$0xff]  ;;  %v71_v9 = vshrl.u32 %v70_v7, 7 }
  0x3b   :  { %1942 = vmatmul.mubr.msk.f32.gmra.mrb[6].mxu0 %vm90_vm0, %v55_v1  ;;  %2085 = vmatprep.subr.bf16.mxu1 %v2999_v61  ;;  %v421_v23 = vld [vmem:[#allocation3 + $0x160] sm:$0xff]  ;;  %v423_v27 = vld [vmem:[#allocation3 + $0x170] sm:$0xff]  ;;  %v3037_v28 = vpack.c.bf16 %v424_v18, %v420_v16  ;;  %v426_v30 = vld [vmem:[#allocation3 + $0x188] sm:$0xff] }
  0x3c   :  { %1950 = vmatmul.mubr.msk.f32.gmra.mrb[6].mxu1 %vm90_vm0, %v55_v1  ;;  %2055 = vmatpush1.bf16.msra.mxu0 %v3006_v2  ;;  %v430_v31 = vld [vmem:[#allocation3 + $0x1a8] sm:$0xff]  ;;  %v3044_v33 = vpack.c.bf16 %v421_v23, %v417_v20  ;;  %v428_v36 = vld [vmem:[#allocation3 + $0x198] sm:$0xff]  ;;  %v3048_v39 = vpack.c.bf16 %v423_v27, %v419_v26  ;;  %v425_v40 = vld [vmem:[#allocation3 + $0x180] sm:$0xff]  ;;  %v72_v10 = vsub.s32 0, %v71_v9  ;;  %v76_v13 = vsub.s32 1, %v71_v9 }
  0x3d   :  { %2087 = vmatpush1.bf16.msra.mxu1 %v3010_v5  ;;  %203 = vmatprep.mubr.f32.mxu0 %v2856_v0  ;;  %v57_v32 = vld [vmem:[%s3424_s0 + $0x28] sm:$0xff]  ;;  %v432_v37 = vld [vmem:[#allocation3 + $0x1b8] sm:$0xff]  ;;  %v429_v41 = vld [vmem:[#allocation3 + $0x1a0] sm:$0xff]  ;;  %v3052_v43 = vpack.c.bf16 %v430_v31, %v426_v30  ;;  %v84_v20 = vsub.s32 3, %v71_v9 }
  0x3e   :  { %316 = vmatprep.mubr.f32.mxu1 %v2856_v0  ;;  %2057 = vmatprep.subr.bf16.mxu0 %v3014_v8  ;;  %v427_v44 = vld [vmem:[#allocation3 + $0x190] sm:$0xff]  ;;  %v3056_v46 = vpack.c.bf16 %v432_v37, %v428_v36  ;;  %v434_v48 = vld [vmem:[#allocation3 + $0x1c8] sm:$0xff]  ;;  %v3063_v52 = vpack.c.bf16 %v429_v41, %v425_v40  ;;  %v436_v53 = vld [vmem:[#allocation3 + $0x1d8] sm:$0xff]  ;;  %v80_v40 = vsub.s32 2, %v71_v9 }
  0x3f   :  { %1943 = vmatmul.mubr.msk.f32.gmra.mrb[8].mxu0 %vm90_vm0, %v56_v14  ;;  %2089 = vmatprep.subr.bf16.mxu1 %v3018_v11  ;;  %v431_v45 = vld [vmem:[#allocation3 + $0x1b0] sm:$0xff]  ;;  %v438_v49 = vld [vmem:[#allocation3 + $0x1e8] sm:$0xff]  ;;  %v440_v55 = vld [vmem:[#allocation3 + $0x1f8] sm:$0xff] }
  0x40   :  { %1951 = vmatmul.mubr.msk.f32.gmra.mrb[8].mxu1 %vm90_vm0, %v56_v14  ;;  %2059 = vmatpush1.bf16.msra.mxu0 %v3025_v15  ;;  %v58_v51 = vld [vmem:[%s3424_s0 + $0x30] sm:$0xff]  ;;  %v3067_v56 = vpack.c.bf16 %v431_v45, %v427_v44  ;;  %v433_v57 = vld [vmem:[#allocation3 + $0x1c0] sm:$0xff]  ;;  %v3071_v60 = vpack.c.bf16 %v438_v49, %v434_v48  ;;  %v3075_v1 = vpack.c.bf16 %v440_v55, %v436_v53  ;;  %v59_v3 = vld [vmem:[%s3424_s0 + $0x38] sm:$0xff] }
  0x41   :  { %2091 = vmatpush1.bf16.msra.mxu1 %v3029_v19  ;;  %209 = vmatprep.mubr.f32.mxu0 %v2856_v0  ;;  %v437_v59 = vld [vmem:[#allocation3 + $0x1e0] sm:$0xff]  ;;  %v435_v62 = vld [vmem:[#allocation3 + $0x1d0] sm:$0xff] }
  0x42   :  { %322 = vmatprep.mubr.f32.mxu1 %v2856_v0  ;;  %2061 = vmatprep.subr.bf16.mxu0 %v3033_v24  ;;  %v439_v63 = vld [vmem:[#allocation3 + $0x1f0] sm:$0xff]  ;;  %v3082_v4 = vpack.c.bf16 %v437_v59, %v433_v57  ;;  %v68_v12 = vld [vmem:[%s3427_s3] sm:$0xf] }
  0x43   :  { %1944 = vmatmul.mubr.msk.f32.gmra.mrb[10].mxu0 %vm90_vm0, %v57_v32  ;;  %2093 = vmatprep.subr.bf16.mxu1 %v3037_v28  ;;  %v3086_v6 = vpack.c.bf16 %v439_v63, %v435_v62  ;;  %v3138_v14 = vrot.slane %v68_v12, %v72_v10  ;;  %v3140_v16 = vrot.slane %v68_v12, %v76_v13 }
  0x44   :  { %1952 = vmatmul.mubr.msk.f32.gmra.mrb[10].mxu1 %vm90_vm0, %v57_v32  ;;  %2063 = vmatpush1.bf16.msra.mxu0 %v3044_v33  ;;  %v3144_v37 = vrot.slane %v68_v12, %v84_v20  ;;  %v3147_v44 = vrot.slane %v68_v12, %v80_v40 }
  0x45   :  { %2095 = vmatpush1.bf16.msra.mxu1 %v3048_v39  ;;  %215 = vmatprep.mubr.f32.mxu0 %v2856_v0 }
  0x46   :  { %328 = vmatprep.mubr.f32.mxu1 %v2856_v0  ;;  %2065 = vmatprep.subr.bf16.mxu0 %v3052_v43 }
  0x47   :  { %1945 = vmatmul.mubr.msk.f32.gmra.mrb[12].mxu0 %vm90_vm0, %v58_v51  ;;  %2097 = vmatprep.subr.bf16.mxu1 %v3056_v46 }
  0x48   :  { %1953 = vmatmul.mubr.msk.f32.gmra.mrb[12].mxu1 %vm90_vm0, %v58_v51  ;;  %2067 = vmatpush1.bf16.msra.mxu0 %v3063_v52 }
  0x49   :  { %2099 = vmatpush1.bf16.msra.mxu1 %v3067_v56  ;;  %221 = vmatprep.mubr.f32.mxu0 %v2856_v0 }
  0x4a   :  { %334 = vmatprep.mubr.f32.mxu1 %v2856_v0  ;;  %2069 = vmatprep.subr.bf16.mxu0 %v3071_v60 }
  0x4b   :  { %1946 = vmatmul.mubr.msk.f32.gmra.mrb[14].mxu0 %vm90_vm0, %v59_v3  ;;  %2101 = vmatprep.subr.bf16.mxu1 %v3075_v1 }
  0x4c   :  { %1954 = vmatmul.mubr.msk.f32.gmra.mrb[14].mxu1 %vm90_vm0, %v59_v3  ;;  %2071 = vmatpush1.bf16.msra.mxu0 %v3082_v4 }
  0x4d   :  { %2103 = vmatpush1.bf16.msra.mxu1 %v3086_v6  ;;  %505 = vmatprep.mubr.f32.mxu0 %v2856_v0 }
  0x4e   :  { %576 = vmatprep.mubr.f32.mxu1 %v2856_v0  ;;  %2105 = vmatprep.subr.bf16.mxu0 %v2948_v17 }
  0x4f   :  { %506 = vmatmul.mubr.f32.vlgmr.msra.gmra.mrb[0].mxu0 %v2856_v0  ;;  %2137 = vmatprep.subr.bf16.mxu1 %v2950_v21 }
  0x50   :  { %577 = vmatmul.mubr.f32.vlgmr.msra.gmra.mrb[0].mxu1 %v2856_v0  ;;  %2107 = vmatpush1.bf16.msra.mxu0 %v2952_v22 }
  0x51   :  { %2139 = vmatpush1.bf16.msra.mxu1 %v2955_v25  ;;  %2109 = vmatprep.subr.bf16.mxu0 %v2959_v29 }
  0x52   :  { %2141 = vmatprep.subr.bf16.mxu1 %v2966_v34  ;;  %679 = vmatprep.mubr.f32.mxu0 %v2856_v0 }
  0x53   :  { %750 = vmatprep.mubr.f32.mxu1 %v2856_v0 }
  0x54   :  { %2111 = vmatpush1.bf16.msra.mxu0 %v2968_v35 }
  0x55   :  { %2143 = vmatpush1.bf16.msra.mxu1 %v2972_v38  ;;  %2113 = vmatprep.subr.bf16.mxu0 %v2976_v42 }
  0x56   :  { %2145 = vmatprep.subr.bf16.mxu1 %v2983_v47 }
  0x58   :  { %2115 = vmatpush1.bf16.msra.mxu0 %v2987_v50 }
  0x59   :  { %2147 = vmatpush1.bf16.msra.mxu1 %v2991_v54  ;;  %2117 = vmatprep.subr.bf16.mxu0 %v2995_v58 }
  0x5a   :  { %2149 = vmatprep.subr.bf16.mxu1 %v2999_v61 }
  0x5c   :  { %2119 = vmatpush1.bf16.msra.mxu0 %v3006_v2 }
  0x5d   :  { %2151 = vmatpush1.bf16.msra.mxu1 %v3010_v5  ;;  %2121 = vmatprep.subr.bf16.mxu0 %v3014_v8 }
  0x5e   :  { %2153 = vmatprep.subr.bf16.mxu1 %v3018_v11 }
  0x60   :  { %2123 = vmatpush1.bf16.msra.mxu0 %v3025_v15 }
  0x61   :  { %2155 = vmatpush1.bf16.msra.mxu1 %v3029_v19  ;;  %2125 = vmatprep.subr.bf16.mxu0 %v3033_v24 }
  0x62   :  { %2157 = vmatprep.subr.bf16.mxu1 %v3037_v28 }
  0x64   :  { %2127 = vmatpush1.bf16.msra.mxu0 %v3044_v33 }
  0x65   :  { %2159 = vmatpush1.bf16.msra.mxu1 %v3048_v39  ;;  %2129 = vmatprep.subr.bf16.mxu0 %v3052_v43 }
  0x66   :  { %2161 = vmatprep.subr.bf16.mxu1 %v3056_v46 }
  0x68   :  { %2131 = vmatpush1.bf16.msra.mxu0 %v3063_v52 }
  0x69   :  { %2163 = vmatpush1.bf16.msra.mxu1 %v3067_v56  ;;  %2133 = vmatprep.subr.bf16.mxu0 %v3071_v60 }
  0x6a   :  { %2165 = vmatprep.subr.bf16.mxu1 %v3075_v1 }
  0x6c   :  { %2135 = vmatpush1.bf16.msra.mxu0 %v3082_v4 }
  0x6d   :  { %2167 = vmatpush1.bf16.msra.mxu1 %v3086_v6  ;;  %2169 = vmatprep.subr.bf16.mxu0 %v2948_v17 }
  0x6e   :  { %2201 = vmatprep.subr.bf16.mxu1 %v2950_v21 }
 0x122   :  { %v507_v18 = vpop.f32.mrb[0].mxu0 }
 0x123   :  { %v2576_v23 = vadd.f32 %v507_v18, %v3138_v14  ;;  %v578_v26 = vpop.f32.mrb[0].mxu1  ;;  %v509_v27 = vpop.f32.mrb[1].mxu0 }
 0x124   :  { %v2577_v30 = vadd.f32 %v509_v27, %v3140_v16  ;;  %v580_v31 = vpop.f32.mrb[1].mxu1  ;;  %v2592_v48 = vadd.f32 %v578_v26, %v3147_v44 }
 0x125   :  { %v1955_v32 = vmul.f32 -1.442695, %v2576_v23  ;;  %v2593_v41 = vadd.f32 %v580_v31, %v3144_v37 }
 0x126   :  { %v1956_v36 = vmul.f32 -1.442695, %v2577_v30 }
 0x127   :  { %2650 = vpow2.f32 %v1955_v32  ;;  %v1957_v45 = vmul.f32 -1.442695, %v2593_v41 }
 0x128   :  { %2652 = vpow2.f32 %v1956_v36 }
 0x129   :  { %2654 = vpow2.f32 %v1957_v45 }
 0x12a   :  { %2656 = vtanh.f32 %v2592_v48 }
 0x131   :  { %v2651_v49 = vpop.eup %2650 }
 0x132   :  { %v2653_v51 = vpop.eup %2652  ;;  %v590_v53 = vadd.f32 1.0, %v2651_v49 }
 0x133   :  { %v596_v55 = vadd.f32 1.0, %v2653_v51  ;;  %v2655_v57 = vpop.eup %2654 }
 0x134   :  { %2658 = vrcp.f32 %v590_v53  ;;  %v2657_v59 = vpop.eup %2656  ;;  %v603_v7 = vadd.f32 1.0, %v2655_v57 }
 0x135   :  { %2660 = vrcp.f32 %v596_v55 }
 0x136   :  { %2662 = vrcp.f32 %v603_v7 }
 0x13e   :  { %v2659_v62 = vpop.eup %2658 }
 0x13f   :  { %v2661_v63 = vpop.eup %2660  ;;  %v607_v3 = vmul.f32 %v2659_v62, %v2657_v59 }
 0x140   :  { %v606_v9 = vmul.f32 0.0, %v2661_v63  ;;  %v2663_v12 = vpop.eup %2662 }
 0x142   :  { %v3150_v10 = vadd.f32 %v607_v3, %v606_v9 }
 0x144   :  { %2664 = vtanh.f32 %v3150_v10 }
 0x14e   :  { %v2665_v13 = vpop.eup %2664 }
 0x14f   :  { %v610_v18 = vmul.f32 %v2665_v13, %v2663_v12 }
 0x151   :  { %680 = vmatmul.mubr.f32.vlgmr.msra.gmra.mrb[2].mxu0 %v610_v18  ;;  %751 = vmatmul.mubr.f32.vlgmr.msra.gmra.mrb[2].mxu1 %v610_v18 }
 0x152   :  { %2171 = vmatpush1.bf16.msra.mxu0 %v2952_v22  ;;  %2203 = vmatpush1.bf16.msra.mxu1 %v2955_v25 }
 0x153   :  { %2173 = vmatprep.subr.bf16.mxu0 %v2959_v29  ;;  %2205 = vmatprep.subr.bf16.mxu1 %v2966_v34 }
 0x154   :  { %853 = vmatprep.mubr.f32.mxu0 %v2856_v0  ;;  %924 = vmatprep.mubr.f32.mxu1 %v2856_v0 }
 0x156   :  { %2175 = vmatpush1.bf16.msra.mxu0 %v2968_v35  ;;  %2207 = vmatpush1.bf16.msra.mxu1 %v2972_v38 }
 0x157   :  { %2177 = vmatprep.subr.bf16.mxu0 %v2976_v42  ;;  %2209 = vmatprep.subr.bf16.mxu1 %v2983_v47 }
 0x15a   :  { %2179 = vmatpush1.bf16.msra.mxu0 %v2987_v50  ;;  %2211 = vmatpush1.bf16.msra.mxu1 %v2991_v54 }
 0x15b   :  { %2181 = vmatprep.subr.bf16.mxu0 %v2995_v58  ;;  %2213 = vmatprep.subr.bf16.mxu1 %v2999_v61 }
 0x15e   :  { %2183 = vmatpush1.bf16.msra.mxu0 %v3006_v2  ;;  %2215 = vmatpush1.bf16.msra.mxu1 %v3010_v5 }
 0x15f   :  { %2185 = vmatprep.subr.bf16.mxu0 %v3014_v8  ;;  %2217 = vmatprep.subr.bf16.mxu1 %v3018_v11 }
 0x162   :  { %2187 = vmatpush1.bf16.msra.mxu0 %v3025_v15  ;;  %2219 = vmatpush1.bf16.msra.mxu1 %v3029_v19 }
 0x163   :  { %2189 = vmatprep.subr.bf16.mxu0 %v3033_v24  ;;  %2221 = vmatprep.subr.bf16.mxu1 %v3037_v28 }
 0x166   :  { %2191 = vmatpush1.bf16.msra.mxu0 %v3044_v33  ;;  %2223 = vmatpush1.bf16.msra.mxu1 %v3048_v39 }
 0x167   :  { %2193 = vmatprep.subr.bf16.mxu0 %v3052_v43  ;;  %2225 = vmatprep.subr.bf16.mxu1 %v3056_v46 }
 0x16a   :  { %2195 = vmatpush1.bf16.msra.mxu0 %v3063_v52  ;;  %2227 = vmatpush1.bf16.msra.mxu1 %v3067_v56 }
 0x16b   :  { %2197 = vmatprep.subr.bf16.mxu0 %v3071_v60  ;;  %2229 = vmatprep.subr.bf16.mxu1 %v3075_v1 }
 0x16e   :  { %2199 = vmatpush1.bf16.msra.mxu0 %v3082_v4  ;;  %2231 = vmatpush1.bf16.msra.mxu1 %v3086_v6 }
 0x16f   :  { %2233 = vmatprep.subr.bf16.mxu0 %v2948_v17  ;;  %2265 = vmatprep.subr.bf16.mxu1 %v2950_v21 }
 0x224   :  { %v681_v20 = vpop.f32.mrb[2].mxu0  ;;  %v752_v23 = vpop.f32.mrb[2].mxu1 }
 0x225   :  { %v2578_v26 = vadd.f32 %v681_v20, %v3138_v14  ;;  %v683_v27 = vpop.f32.mrb[3].mxu0  ;;  %v754_v30 = vpop.f32.mrb[3].mxu1  ;;  %v2594_v45 = vadd.f32 %v752_v23, %v3147_v44 }
 0x226   :  { %v2579_v31 = vadd.f32 %v683_v27, %v3140_v16  ;;  %v2595_v40 = vadd.f32 %v754_v30, %v3144_v37 }
 0x227   :  { %v1958_v32 = vmul.f32 -1.442695, %v2578_v26 }
 0x228   :  { %v1959_v36 = vmul.f32 -1.442695, %v2579_v31  ;;  %v1960_v41 = vmul.f32 -1.442695, %v2595_v40 }
 0x229   :  { %2666 = vpow2.f32 %v1958_v32 }
 0x22a   :  { %2668 = vpow2.f32 %v1959_v36 }
 0x22b   :  { %2670 = vpow2.f32 %v1960_v41 }
 0x22c   :  { %2672 = vtanh.f32 %v2594_v45 }
 0x233   :  { %v2667_v48 = vpop.eup %2666 }
 0x234   :  { %v2669_v49 = vpop.eup %2668  ;;  %v764_v51 = vadd.f32 1.0, %v2667_v48 }
 0x235   :  { %v770_v53 = vadd.f32 1.0, %v2669_v49  ;;  %v2671_v55 = vpop.eup %2670 }
 0x236   :  { %2674 = vrcp.f32 %v764_v51  ;;  %v2673_v57 = vpop.eup %2672  ;;  %v777_v3 = vadd.f32 1.0, %v2671_v55 }
 0x237   :  { %2676 = vrcp.f32 %v770_v53 }
 0x238   :  { %2678 = vrcp.f32 %v777_v3 }
 0x240   :  { %v2675_v59 = vpop.eup %2674 }
 0x241   :  { %v2677_v62 = vpop.eup %2676  ;;  %v781_v63 = vmul.f32 %v2675_v59, %v2673_v57 }
 0x242   :  { %v780_v7 = vmul.f32 %v2677_v62, %v3150_v10  ;;  %v2679_v12 = vpop.eup %2678 }
 0x244   :  { %v3192_v9 = vadd.f32 %v781_v63, %v780_v7 }
 0x246   :  { %2680 = vtanh.f32 %v3192_v9 }
 0x250   :  { %v2681_v13 = vpop.eup %2680 }
 0x251   :  { %v784_v18 = vmul.f32 %v2681_v13, %v2679_v12 }
 0x253   :  { %854 = vmatmul.mubr.f32.vlgmr.msra.gmra.mrb[4].mxu0 %v784_v18  ;;  %925 = vmatmul.mubr.f32.vlgmr.msra.gmra.mrb[4].mxu1 %v784_v18 }
 0x254   :  { %2235 = vmatpush1.bf16.msra.mxu0 %v2952_v22  ;;  %2267 = vmatpush1.bf16.msra.mxu1 %v2955_v25 }
 0x255   :  { %2237 = vmatprep.subr.bf16.mxu0 %v2959_v29  ;;  %2269 = vmatprep.subr.bf16.mxu1 %v2966_v34 }
 0x256   :  { %1027 = vmatprep.mubr.f32.mxu0 %v2856_v0  ;;  %1098 = vmatprep.mubr.f32.mxu1 %v2856_v0 }
 0x258   :  { %2239 = vmatpush1.bf16.msra.mxu0 %v2968_v35  ;;  %2271 = vmatpush1.bf16.msra.mxu1 %v2972_v38 }
 0x259   :  { %2241 = vmatprep.subr.bf16.mxu0 %v2976_v42  ;;  %2273 = vmatprep.subr.bf16.mxu1 %v2983_v47 }
 0x25c   :  { %2243 = vmatpush1.bf16.msra.mxu0 %v2987_v50  ;;  %2275 = vmatpush1.bf16.msra.mxu1 %v2991_v54 }
 0x25d   :  { %2245 = vmatprep.subr.bf16.mxu0 %v2995_v58  ;;  %2277 = vmatprep.subr.bf16.mxu1 %v2999_v61 }
 0x260   :  { %2247 = vmatpush1.bf16.msra.mxu0 %v3006_v2  ;;  %2279 = vmatpush1.bf16.msra.mxu1 %v3010_v5 }
 0x261   :  { %2249 = vmatprep.subr.bf16.mxu0 %v3014_v8  ;;  %2281 = vmatprep.subr.bf16.mxu1 %v3018_v11 }
 0x264   :  { %2251 = vmatpush1.bf16.msra.mxu0 %v3025_v15  ;;  %2283 = vmatpush1.bf16.msra.mxu1 %v3029_v19 }
 0x265   :  { %2253 = vmatprep.subr.bf16.mxu0 %v3033_v24  ;;  %2285 = vmatprep.subr.bf16.mxu1 %v3037_v28 }
 0x268   :  { %2255 = vmatpush1.bf16.msra.mxu0 %v3044_v33  ;;  %2287 = vmatpush1.bf16.msra.mxu1 %v3048_v39 }
 0x269   :  { %2257 = vmatprep.subr.bf16.mxu0 %v3052_v43  ;;  %2289 = vmatprep.subr.bf16.mxu1 %v3056_v46 }
 0x26c   :  { %2259 = vmatpush1.bf16.msra.mxu0 %v3063_v52  ;;  %2291 = vmatpush1.bf16.msra.mxu1 %v3067_v56 }
 0x26d   :  { %2261 = vmatprep.subr.bf16.mxu0 %v3071_v60  ;;  %2293 = vmatprep.subr.bf16.mxu1 %v3075_v1 }
 0x270   :  { %2263 = vmatpush1.bf16.msra.mxu0 %v3082_v4  ;;  %2295 = vmatpush1.bf16.msra.mxu1 %v3086_v6 }
 0x271   :  { %2297 = vmatprep.subr.bf16.mxu0 %v2948_v17  ;;  %2329 = vmatprep.subr.bf16.mxu1 %v2950_v21 }
 0x326   :  { %v855_v10 = vpop.f32.mrb[4].mxu0  ;;  %v926_v20 = vpop.f32.mrb[4].mxu1 }
 0x327   :  { %v2580_v23 = vadd.f32 %v855_v10, %v3138_v14  ;;  %v857_v26 = vpop.f32.mrb[5].mxu0  ;;  %v928_v27 = vpop.f32.mrb[5].mxu1  ;;  %v2596_v41 = vadd.f32 %v926_v20, %v3147_v44 }
 0x328   :  { %v2581_v30 = vadd.f32 %v857_v26, %v3140_v16  ;;  %v2597_v36 = vadd.f32 %v928_v27, %v3144_v37 }
 0x329   :  { %v1961_v31 = vmul.f32 -1.442695, %v2580_v23 }
 0x32a   :  { %v1962_v32 = vmul.f32 -1.442695, %v2581_v30  ;;  %v1963_v40 = vmul.f32 -1.442695, %v2597_v36 }
 0x32b   :  { %2682 = vpow2.f32 %v1961_v31 }
 0x32c   :  { %2684 = vpow2.f32 %v1962_v32 }
 0x32d   :  { %2686 = vpow2.f32 %v1963_v40 }
 0x32e   :  { %2688 = vtanh.f32 %v2596_v41 }
 0x335   :  { %v2683_v45 = vpop.eup %2682 }
 0x336   :  { %v2685_v48 = vpop.eup %2684  ;;  %v938_v49 = vadd.f32 1.0, %v2683_v45 }
 0x337   :  { %v944_v51 = vadd.f32 1.0, %v2685_v48  ;;  %v2687_v53 = vpop.eup %2686 }
 0x338   :  { %2690 = vrcp.f32 %v938_v49  ;;  %v2689_v55 = vpop.eup %2688  ;;  %v951_v63 = vadd.f32 1.0, %v2687_v53 }
 0x339   :  { %2692 = vrcp.f32 %v944_v51 }
 0x33a   :  { %2694 = vrcp.f32 %v951_v63 }
 0x342   :  { %v2691_v57 = vpop.eup %2690 }
 0x343   :  { %v2693_v59 = vpop.eup %2692  ;;  %v955_v62 = vmul.f32 %v2691_v57, %v2689_v55 }
 0x344   :  { %v954_v3 = vmul.f32 %v2693_v59, %v3192_v9  ;;  %v2695_v12 = vpop.eup %2694 }
 0x346   :  { %v3234_v7 = vadd.f32 %v955_v62, %v954_v3 }
 0x348   :  { %2696 = vtanh.f32 %v3234_v7 }
 0x352   :  { %v2697_v13 = vpop.eup %2696 }
 0x353   :  { %v958_v18 = vmul.f32 %v2697_v13, %v2695_v12 }
 0x355   :  { %1028 = vmatmul.mubr.f32.vlgmr.msra.gmra.mrb[6].mxu0 %v958_v18  ;;  %1099 = vmatmul.mubr.f32.vlgmr.msra.gmra.mrb[6].mxu1 %v958_v18 }
 0x356   :  { %2299 = vmatpush1.bf16.msra.mxu0 %v2952_v22  ;;  %2331 = vmatpush1.bf16.msra.mxu1 %v2955_v25 }
 0x357   :  { %2301 = vmatprep.subr.bf16.mxu0 %v2959_v29  ;;  %2333 = vmatprep.subr.bf16.mxu1 %v2966_v34 }
 0x358   :  { %1201 = vmatprep.mubr.f32.mxu0 %v2856_v0  ;;  %1272 = vmatprep.mubr.f32.mxu1 %v2856_v0 }
 0x35a   :  { %2303 = vmatpush1.bf16.msra.mxu0 %v2968_v35  ;;  %2335 = vmatpush1.bf16.msra.mxu1 %v2972_v38 }
 0x35b   :  { %2305 = vmatprep.subr.bf16.mxu0 %v2976_v42  ;;  %2337 = vmatprep.subr.bf16.mxu1 %v2983_v47 }
 0x35e   :  { %2307 = vmatpush1.bf16.msra.mxu0 %v2987_v50  ;;  %2339 = vmatpush1.bf16.msra.mxu1 %v2991_v54 }
 0x35f   :  { %2309 = vmatprep.subr.bf16.mxu0 %v2995_v58  ;;  %2341 = vmatprep.subr.bf16.mxu1 %v2999_v61 }
 0x362   :  { %2311 = vmatpush1.bf16.msra.mxu0 %v3006_v2  ;;  %2343 = vmatpush1.bf16.msra.mxu1 %v3010_v5 }
 0x363   :  { %2313 = vmatprep.subr.bf16.mxu0 %v3014_v8  ;;  %2345 = vmatprep.subr.bf16.mxu1 %v3018_v11 }
 0x366   :  { %2315 = vmatpush1.bf16.msra.mxu0 %v3025_v15  ;;  %2347 = vmatpush1.bf16.msra.mxu1 %v3029_v19 }
 0x367   :  { %2317 = vmatprep.subr.bf16.mxu0 %v3033_v24  ;;  %2349 = vmatprep.subr.bf16.mxu1 %v3037_v28 }
 0x36a   :  { %2319 = vmatpush1.bf16.msra.mxu0 %v3044_v33  ;;  %2351 = vmatpush1.bf16.msra.mxu1 %v3048_v39 }
 0x36b   :  { %2321 = vmatprep.subr.bf16.mxu0 %v3052_v43  ;;  %2353 = vmatprep.subr.bf16.mxu1 %v3056_v46 }
 0x36e   :  { %2323 = vmatpush1.bf16.msra.mxu0 %v3063_v52  ;;  %2355 = vmatpush1.bf16.msra.mxu1 %v3067_v56 }
 0x36f   :  { %2325 = vmatprep.subr.bf16.mxu0 %v3071_v60  ;;  %2357 = vmatprep.subr.bf16.mxu1 %v3075_v1 }
 0x372   :  { %2327 = vmatpush1.bf16.msra.mxu0 %v3082_v4  ;;  %2359 = vmatpush1.bf16.msra.mxu1 %v3086_v6 }
 0x373   :  { %2361 = vmatprep.subr.bf16.mxu0 %v2948_v17  ;;  %2393 = vmatprep.subr.bf16.mxu1 %v2950_v21 }
 0x428   :  { %v1029_v9 = vpop.f32.mrb[6].mxu0  ;;  %v1100_v10 = vpop.f32.mrb[6].mxu1 }
 0x429   :  { %v2582_v20 = vadd.f32 %v1029_v9, %v3138_v14  ;;  %v1031_v23 = vpop.f32.mrb[7].mxu0  ;;  %v1102_v26 = vpop.f32.mrb[7].mxu1  ;;  %v2598_v40 = vadd.f32 %v1100_v10, %v3147_v44 }
 0x42a   :  { %v2583_v27 = vadd.f32 %v1031_v23, %v3140_v16  ;;  %v2599_v32 = vadd.f32 %v1102_v26, %v3144_v37 }
 0x42b   :  { %v1964_v30 = vmul.f32 -1.442695, %v2582_v20 }
 0x42c   :  { %v1965_v31 = vmul.f32 -1.442695, %v2583_v27  ;;  %v1966_v36 = vmul.f32 -1.442695, %v2599_v32 }
 0x42d   :  { %2698 = vpow2.f32 %v1964_v30 }
 0x42e   :  { %2700 = vpow2.f32 %v1965_v31 }
 0x42f   :  { %2702 = vpow2.f32 %v1966_v36 }
 0x430   :  { %2704 = vtanh.f32 %v2598_v40 }
 0x437   :  { %v2699_v41 = vpop.eup %2698 }
 0x438   :  { %v2701_v45 = vpop.eup %2700  ;;  %v1112_v48 = vadd.f32 1.0, %v2699_v41 }
 0x439   :  { %v1118_v49 = vadd.f32 1.0, %v2701_v45  ;;  %v2703_v51 = vpop.eup %2702 }
 0x43a   :  { %2706 = vrcp.f32 %v1112_v48  ;;  %v2705_v53 = vpop.eup %2704  ;;  %v1125_v62 = vadd.f32 1.0, %v2703_v51 }
 0x43b   :  { %2708 = vrcp.f32 %v1118_v49 }
 0x43c   :  { %2710 = vrcp.f32 %v1125_v62 }
 0x444   :  { %v2707_v55 = vpop.eup %2706 }
 0x445   :  { %v2709_v57 = vpop.eup %2708  ;;  %v1129_v59 = vmul.f32 %v2707_v55, %v2705_v53 }
 0x446   :  { %v1128_v63 = vmul.f32 %v2709_v57, %v3234_v7  ;;  %v2711_v12 = vpop.eup %2710 }
 0x448   :  { %v3276_v3 = vadd.f32 %v1129_v59, %v1128_v63 }
 0x44a   :  { %2712 = vtanh.f32 %v3276_v3 }
 0x454   :  { %v2713_v13 = vpop.eup %2712 }
 0x455   :  { %v1132_v18 = vmul.f32 %v2713_v13, %v2711_v12 }
 0x457   :  { %1202 = vmatmul.mubr.f32.vlgmr.msra.gmra.mrb[8].mxu0 %v1132_v18  ;;  %1273 = vmatmul.mubr.f32.vlgmr.msra.gmra.mrb[8].mxu1 %v1132_v18 }
 0x458   :  { %2363 = vmatpush1.bf16.msra.mxu0 %v2952_v22  ;;  %2395 = vmatpush1.bf16.msra.mxu1 %v2955_v25 }
 0x459   :  { %2365 = vmatprep.subr.bf16.mxu0 %v2959_v29  ;;  %2397 = vmatprep.subr.bf16.mxu1 %v2966_v34 }
 0x45a   :  { %1375 = vmatprep.mubr.f32.mxu0 %v2856_v0  ;;  %1446 = vmatprep.mubr.f32.mxu1 %v2856_v0 }
 0x45c   :  { %2367 = vmatpush1.bf16.msra.mxu0 %v2968_v35  ;;  %2399 = vmatpush1.bf16.msra.mxu1 %v2972_v38 }
 0x45d   :  { %2369 = vmatprep.subr.bf16.mxu0 %v2976_v42  ;;  %2401 = vmatprep.subr.bf16.mxu1 %v2983_v47 }
 0x460   :  { %2371 = vmatpush1.bf16.msra.mxu0 %v2987_v50  ;;  %2403 = vmatpush1.bf16.msra.mxu1 %v2991_v54 }
 0x461   :  { %2373 = vmatprep.subr.bf16.mxu0 %v2995_v58  ;;  %2405 = vmatprep.subr.bf16.mxu1 %v2999_v61 }
 0x464   :  { %2375 = vmatpush1.bf16.msra.mxu0 %v3006_v2  ;;  %2407 = vmatpush1.bf16.msra.mxu1 %v3010_v5 }
 0x465   :  { %2377 = vmatprep.subr.bf16.mxu0 %v3014_v8  ;;  %2409 = vmatprep.subr.bf16.mxu1 %v3018_v11 }
 0x468   :  { %2379 = vmatpush1.bf16.msra.mxu0 %v3025_v15  ;;  %2411 = vmatpush1.bf16.msra.mxu1 %v3029_v19 }
 0x469   :  { %2381 = vmatprep.subr.bf16.mxu0 %v3033_v24  ;;  %2413 = vmatprep.subr.bf16.mxu1 %v3037_v28 }
 0x46c   :  { %2383 = vmatpush1.bf16.msra.mxu0 %v3044_v33  ;;  %2415 = vmatpush1.bf16.msra.mxu1 %v3048_v39 }
 0x46d   :  { %2385 = vmatprep.subr.bf16.mxu0 %v3052_v43  ;;  %2417 = vmatprep.subr.bf16.mxu1 %v3056_v46 }
 0x470   :  { %2387 = vmatpush1.bf16.msra.mxu0 %v3063_v52  ;;  %2419 = vmatpush1.bf16.msra.mxu1 %v3067_v56 }
 0x471   :  { %2389 = vmatprep.subr.bf16.mxu0 %v3071_v60  ;;  %2421 = vmatprep.subr.bf16.mxu1 %v3075_v1 }
 0x474   :  { %2391 = vmatpush1.bf16.msra.mxu0 %v3082_v4  ;;  %2423 = vmatpush1.bf16.msra.mxu1 %v3086_v6 }
 0x475   :  { %2425 = vmatprep.subr.bf16.mxu0 %v2948_v17  ;;  %2457 = vmatprep.subr.bf16.mxu1 %v2950_v21 }
 0x52a   :  { %v1203_v7 = vpop.f32.mrb[8].mxu0  ;;  %v1274_v9 = vpop.f32.mrb[8].mxu1 }
 0x52b   :  { %v2584_v10 = vadd.f32 %v1203_v7, %v3138_v14  ;;  %v1205_v20 = vpop.f32.mrb[9].mxu0  ;;  %v1276_v23 = vpop.f32.mrb[9].mxu1  ;;  %v2600_v36 = vadd.f32 %v1274_v9, %v3147_v44 }
 0x52c   :  { %v2585_v26 = vadd.f32 %v1205_v20, %v3140_v16  ;;  %v2601_v31 = vadd.f32 %v1276_v23, %v3144_v37 }
 0x52d   :  { %v1967_v27 = vmul.f32 -1.442695, %v2584_v10 }
 0x52e   :  { %v1968_v30 = vmul.f32 -1.442695, %v2585_v26  ;;  %v1969_v32 = vmul.f32 -1.442695, %v2601_v31 }
 0x52f   :  { %2714 = vpow2.f32 %v1967_v27 }
 0x530   :  { %2716 = vpow2.f32 %v1968_v30 }
 0x531   :  { %2718 = vpow2.f32 %v1969_v32 }
 0x532   :  { %2720 = vtanh.f32 %v2600_v36 }
 0x539   :  { %v2715_v40 = vpop.eup %2714 }
 0x53a   :  { %v2717_v41 = vpop.eup %2716  ;;  %v1286_v45 = vadd.f32 1.0, %v2715_v40 }
 0x53b   :  { %v1292_v48 = vadd.f32 1.0, %v2717_v41  ;;  %v2719_v49 = vpop.eup %2718 }
 0x53c   :  { %2722 = vrcp.f32 %v1286_v45  ;;  %v2721_v51 = vpop.eup %2720  ;;  %v1299_v59 = vadd.f32 1.0, %v2719_v49 }
 0x53d   :  { %2724 = vrcp.f32 %v1292_v48 }
 0x53e   :  { %2726 = vrcp.f32 %v1299_v59 }
 0x546   :  { %v2723_v53 = vpop.eup %2722 }
 0x547   :  { %v2725_v55 = vpop.eup %2724  ;;  %v1303_v57 = vmul.f32 %v2723_v53, %v2721_v51 }
 0x548   :  { %v1302_v62 = vmul.f32 %v2725_v55, %v3276_v3  ;;  %v2727_v12 = vpop.eup %2726 }
 0x54a   :  { %v3318_v63 = vadd.f32 %v1303_v57, %v1302_v62 }
 0x54c   :  { %2728 = vtanh.f32 %v3318_v63 }
 0x556   :  { %v2729_v13 = vpop.eup %2728 }
 0x557   :  { %v1306_v18 = vmul.f32 %v2729_v13, %v2727_v12  ;;  %v1832_v13 = vld [vmem:[#allocation6 + $0x18] sm:$0xff] }
 0x559   :  { %1376 = vmatmul.mubr.f32.vlgmr.msra.gmra.mrb[10].mxu0 %v1306_v18  ;;  %1447 = vmatmul.mubr.f32.vlgmr.msra.gmra.mrb[10].mxu1 %v1306_v18 }
 0x55a   :  { %2427 = vmatpush1.bf16.msra.mxu0 %v2952_v22  ;;  %2459 = vmatpush1.bf16.msra.mxu1 %v2955_v25 }
 0x55b   :  { %2429 = vmatprep.subr.bf16.mxu0 %v2959_v29  ;;  %2461 = vmatprep.subr.bf16.mxu1 %v2966_v34 }
 0x55c   :  { %1549 = vmatprep.mubr.f32.mxu0 %v2856_v0  ;;  %1620 = vmatprep.mubr.f32.mxu1 %v2856_v0 }
 0x55e   :  { %2431 = vmatpush1.bf16.msra.mxu0 %v2968_v35  ;;  %2463 = vmatpush1.bf16.msra.mxu1 %v2972_v38 }
 0x55f   :  { %2433 = vmatprep.subr.bf16.mxu0 %v2976_v42  ;;  %2465 = vmatprep.subr.bf16.mxu1 %v2983_v47 }
 0x562   :  { %2435 = vmatpush1.bf16.msra.mxu0 %v2987_v50  ;;  %2467 = vmatpush1.bf16.msra.mxu1 %v2991_v54 }
 0x563   :  { %2437 = vmatprep.subr.bf16.mxu0 %v2995_v58  ;;  %2469 = vmatprep.subr.bf16.mxu1 %v2999_v61 }
 0x566   :  { %2439 = vmatpush1.bf16.msra.mxu0 %v3006_v2  ;;  %2471 = vmatpush1.bf16.msra.mxu1 %v3010_v5 }
 0x567   :  { %2441 = vmatprep.subr.bf16.mxu0 %v3014_v8  ;;  %2473 = vmatprep.subr.bf16.mxu1 %v3018_v11 }
 0x56a   :  { %2443 = vmatpush1.bf16.msra.mxu0 %v3025_v15  ;;  %2475 = vmatpush1.bf16.msra.mxu1 %v3029_v19 }
 0x56b   :  { %2445 = vmatprep.subr.bf16.mxu0 %v3033_v24  ;;  %2477 = vmatprep.subr.bf16.mxu1 %v3037_v28 }
 0x56e   :  { %2447 = vmatpush1.bf16.msra.mxu0 %v3044_v33  ;;  %2479 = vmatpush1.bf16.msra.mxu1 %v3048_v39 }
 0x56f   :  { %2449 = vmatprep.subr.bf16.mxu0 %v3052_v43  ;;  %2481 = vmatprep.subr.bf16.mxu1 %v3056_v46 }
 0x572   :  { %2451 = vmatpush1.bf16.msra.mxu0 %v3063_v52  ;;  %2483 = vmatpush1.bf16.msra.mxu1 %v3067_v56 }
 0x573   :  { %2453 = vmatprep.subr.bf16.mxu0 %v3071_v60  ;;  %2485 = vmatprep.subr.bf16.mxu1 %v3075_v1 }
 0x576   :  { %2455 = vmatpush1.bf16.msra.mxu0 %v3082_v4  ;;  %2487 = vmatpush1.bf16.msra.mxu1 %v3086_v6 }
 0x577   :  { %2489 = vmatprep.subr.bf16.mxu0 %v2948_v17  ;;  %2521 = vmatprep.subr.bf16.mxu1 %v2950_v21 }
 0x62c   :  { %v1377_v3 = vpop.f32.mrb[10].mxu0  ;;  %v1448_v7 = vpop.f32.mrb[10].mxu1 }
 0x62d   :  { %v2586_v9 = vadd.f32 %v1377_v3, %v3138_v14  ;;  %v1379_v10 = vpop.f32.mrb[11].mxu0  ;;  %v1450_v20 = vpop.f32.mrb[11].mxu1  ;;  %v2602_v32 = vadd.f32 %v1448_v7, %v3147_v44  ;;  %v1833_v3 = vld [vmem:[#allocation6 + $0x20] sm:$0xff]  ;;  %v1834_v7 = vld [vmem:[#allocation6 + $0x28] sm:$0xff] }
 0x62e   :  { %v2587_v23 = vadd.f32 %v1379_v10, %v3140_v16  ;;  %v2603_v30 = vadd.f32 %v1450_v20, %v3144_v37  ;;  %v1835_v10 = vld [vmem:[#allocation6 + $0x30] sm:$0xff]  ;;  %v1836_v20 = vld [vmem:[#allocation6 + $0x38] sm:$0xff] }
 0x62f   :  { %v1970_v26 = vmul.f32 -1.442695, %v2586_v9  ;;  %v2559_v9 = vpack.c.bf16 %v1834_v7, %v1833_v3 }
 0x630   :  { %v1971_v27 = vmul.f32 -1.442695, %v2587_v23  ;;  %v1972_v31 = vmul.f32 -1.442695, %v2603_v30  ;;  %v2562_v23 = vpack.c.bf16 %v1836_v20, %v1835_v10 }
 0x631   :  { %2730 = vpow2.f32 %v1970_v26  ;;  %v1837_v26 = vld [vmem:[#allocation6 + $0x40] sm:$0xff] }
 0x632   :  { %2732 = vpow2.f32 %v1971_v27  ;;  %v1838_v27 = vld [vmem:[#allocation6 + $0x48] sm:$0xff] }
 0x633   :  { %2734 = vpow2.f32 %v1972_v31  ;;  %v2565_v30 = vpack.c.bf16 %v1838_v27, %v1837_v26  ;;  %v1839_v31 = vld [vmem:[#allocation6 + $0x50] sm:$0xff] }
 0x634   :  { %2736 = vtanh.f32 %v2602_v32  ;;  %v1840_v32 = vld [vmem:[#allocation6 + $0x58] sm:$0xff] }
 0x63b   :  { %v2731_v17 = vpop.eup %2730 }
 0x63c   :  { %v2733_v36 = vpop.eup %2732  ;;  %v1460_v21 = vadd.f32 1.0, %v2731_v17  ;;  %v1841_v17 = vld [vmem:[#allocation6 + $0x60] sm:$0xff] }
 0x63d   :  { %v1466_v40 = vadd.f32 1.0, %v2733_v36  ;;  %v2735_v41 = vpop.eup %2734  ;;  %v2568_v36 = vpack.c.bf16 %v1840_v32, %v1839_v31 }
 0x63e   :  { %2738 = vrcp.f32 %v1460_v21  ;;  %v2737_v45 = vpop.eup %2736  ;;  %v1473_v53 = vadd.f32 1.0, %v2735_v41  ;;  %v1842_v21 = vld [vmem:[#allocation6 + $0x68] sm:$0xff]  ;;  %v1843_v41 = vld [vmem:[#allocation6 + $0x70] sm:$0xff] }
 0x63f   :  { %2740 = vrcp.f32 %v1466_v40  ;;  %v2571_v40 = vpack.c.bf16 %v1842_v21, %v1841_v17 }
 0x640   :  { %2742 = vrcp.f32 %v1473_v53 }
 0x648   :  { %v2739_v48 = vpop.eup %2738 }
 0x649   :  { %v2741_v49 = vpop.eup %2740  ;;  %v1477_v51 = vmul.f32 %v2739_v48, %v2737_v45  ;;  %v1844_v45 = vld [vmem:[#allocation6 + $0x78] sm:$0xff] }
 0x64a   :  { %v1476_v55 = vmul.f32 %v2741_v49, %v3318_v63  ;;  %v2743_v59 = vpop.eup %2742  ;;  %v1831_v63 = vld [vmem:[#allocation6 + $0x10] sm:$0xff]  ;;  %v2574_v48 = vpack.c.bf16 %v1844_v45, %v1843_v41 }
 0x64b   :  { %v2556_v18 = vpack.c.bf16 %v1832_v13, %v1831_v63 }
 0x64c   :  { %v3360_v57 = vadd.f32 %v1477_v51, %v1476_v55 }
 0x64e   :  { %2744 = vtanh.f32 %v3360_v57 }
 0x658   :  { %v2745_v62 = vpop.eup %2744 }
 0x659   :  { %v1480_v12 = vmul.f32 %v2745_v62, %v2743_v59 }
 0x65b   :  { %1550 = vmatmul.mubr.f32.vlgmr.msra.gmra.mrb[12].mxu0 %v1480_v12  ;;  %1621 = vmatmul.mubr.f32.vlgmr.msra.gmra.mrb[12].mxu1 %v1480_v12 }
 0x65c   :  { %2491 = vmatpush1.bf16.msra.mxu0 %v2952_v22  ;;  %2523 = vmatpush1.bf16.msra.mxu1 %v2955_v25 }
 0x65d   :  { %2493 = vmatprep.subr.bf16.mxu0 %v2959_v29  ;;  %2525 = vmatprep.subr.bf16.mxu1 %v2966_v34 }
 0x65e   :  { %1723 = vmatprep.mubr.f32.mxu0 %v2856_v0  ;;  %1794 = vmatprep.mubr.f32.mxu1 %v2856_v0 }
 0x660   :  { %2495 = vmatpush1.bf16.msra.mxu0 %v2968_v35  ;;  %2527 = vmatpush1.bf16.msra.mxu1 %v2972_v38 }
 0x661   :  { %2497 = vmatprep.subr.bf16.mxu0 %v2976_v42  ;;  %2529 = vmatprep.subr.bf16.mxu1 %v2983_v47 }
 0x664   :  { %2499 = vmatpush1.bf16.msra.mxu0 %v2987_v50  ;;  %2531 = vmatpush1.bf16.msra.mxu1 %v2991_v54 }
 0x665   :  { %2501 = vmatprep.subr.bf16.mxu0 %v2995_v58  ;;  %2533 = vmatprep.subr.bf16.mxu1 %v2999_v61 }
 0x668   :  { %2503 = vmatpush1.bf16.msra.mxu0 %v3006_v2  ;;  %2535 = vmatpush1.bf16.msra.mxu1 %v3010_v5 }
 0x669   :  { %2505 = vmatprep.subr.bf16.mxu0 %v3014_v8  ;;  %2537 = vmatprep.subr.bf16.mxu1 %v3018_v11 }
 0x66c   :  { %2507 = vmatpush1.bf16.msra.mxu0 %v3025_v15  ;;  %2539 = vmatpush1.bf16.msra.mxu1 %v3029_v19 }
 0x66d   :  { %2509 = vmatprep.subr.bf16.mxu0 %v3033_v24  ;;  %2541 = vmatprep.subr.bf16.mxu1 %v3037_v28 }
 0x670   :  { %2511 = vmatpush1.bf16.msra.mxu0 %v3044_v33  ;;  %2543 = vmatpush1.bf16.msra.mxu1 %v3048_v39 }
 0x671   :  { %2513 = vmatprep.subr.bf16.mxu0 %v3052_v43  ;;  %2545 = vmatprep.subr.bf16.mxu1 %v3056_v46 }
 0x674   :  { %2515 = vmatpush1.bf16.msra.mxu0 %v3063_v52  ;;  %2547 = vmatpush1.bf16.msra.mxu1 %v3067_v56 }
 0x675   :  { %2517 = vmatprep.subr.bf16.mxu0 %v3071_v60  ;;  %2549 = vmatprep.subr.bf16.mxu1 %v3075_v1  ;;  %v1829_v60 = vld [vmem:[#allocation6] sm:$0xff]  ;;  %v1830_v1 = vld [vmem:[#allocation6 + $0x8] sm:$0xff] }
 0x678   :  { %2519 = vmatpush1.bf16.msra.mxu0 %v3082_v4  ;;  %2551 = vmatpush1.bf16.msra.mxu1 %v3086_v6  ;;  %v2553_v4 = vpack.c.bf16 %v1830_v1, %v1829_v60  ;;  %v2857_v6 = vmov 0.0|0.0  }
 0x679   :  { %2552 = vmatprep.subr.bf16.mxu0 %v2857_v6 }
 0x72e   :  { %v1551_v22 = vpop.f32.mrb[12].mxu0  ;;  %v1622_v25 = vpop.f32.mrb[12].mxu1 }
 0x72f   :  { %v2588_v29 = vadd.f32 %v1551_v22, %v3138_v14  ;;  %v1553_v34 = vpop.f32.mrb[13].mxu0  ;;  %v1624_v35 = vpop.f32.mrb[13].mxu1  ;;  %v2604_v58 = vadd.f32 %v1622_v25, %v3147_v44 }
 0x730   :  { %v2589_v38 = vadd.f32 %v1553_v34, %v3140_v16  ;;  %v2605_v50 = vadd.f32 %v1624_v35, %v3144_v37 }
 0x731   :  { %v1973_v42 = vmul.f32 -1.442695, %v2588_v29 }
 0x732   :  { %v1974_v47 = vmul.f32 -1.442695, %v2589_v38  ;;  %v1975_v54 = vmul.f32 -1.442695, %v2605_v50 }
 0x733   :  { %2746 = vpow2.f32 %v1973_v42 }
 0x734   :  { %2748 = vpow2.f32 %v1974_v47 }
 0x735   :  { %2750 = vpow2.f32 %v1975_v54 }
 0x736   :  { %2752 = vtanh.f32 %v2604_v58 }
 0x73d   :  { %v2747_v61 = vpop.eup %2746 }
 0x73e   :  { %v2749_v2 = vpop.eup %2748  ;;  %v1634_v5 = vadd.f32 1.0, %v2747_v61 }
 0x73f   :  { %v1640_v8 = vadd.f32 1.0, %v2749_v2  ;;  %v2751_v11 = vpop.eup %2750 }
 0x740   :  { %2754 = vrcp.f32 %v1634_v5  ;;  %v2753_v15 = vpop.eup %2752  ;;  %v1647_v33 = vadd.f32 1.0, %v2751_v11  ;;  %v1979_v5 = vld [vmem:[%s3429_s5] ss:$0 sm:$0xff] }
 0x741   :  { %2756 = vrcp.f32 %v1640_v8 }
 0x742   :  { %2758 = vrcp.f32 %v1647_v33 }
 0x74a   :  { %v2755_v19 = vpop.eup %2754 }
 0x74b   :  { %v2757_v24 = vpop.eup %2756  ;;  %v1651_v28 = vmul.f32 %v2755_v19, %v2753_v15 }
 0x74c   :  { %v1650_v39 = vmul.f32 %v2757_v24, %v3360_v57  ;;  %v2759_v46 = vpop.eup %2758 }
 0x74e   :  { %v3400_v43 = vadd.f32 %v1651_v28, %v1650_v39 }
 0x750   :  { %2760 = vtanh.f32 %v3400_v43 }
 0x75a   :  { %v2761_v52 = vpop.eup %2760 }
 0x75b   :  { %v1654_v56 = vmul.f32 %v2761_v52, %v2759_v46 }
 0x75d   :  { %1724 = vmatmul.mubr.f32.vlgmr.msra.gmra.mrb[14].mxu0 %v1654_v56  ;;  %1795 = vmatmul.mubr.f32.vlgmr.msra.gmra.mrb[14].mxu1 %v1654_v56 }
 0x75e   :  { %2554 = vmatpush3.bf16.msra.mxu0 %v2553_v4  ;;  %2029 = vmatprep.mubr.msk.f32.mxu0 %vm2858_vm1, %v2856_v0 }
 0x75f   :  { %2555 = vmatprep.subr.bf16.mxu0 %v2857_v6 }
 0x762   :  { %2557 = vmatpush3.bf16.msra.mxu0 %v2556_v18 }
 0x763   :  { %2558 = vmatprep.subr.bf16.mxu0 %v2857_v6 }
 0x766   :  { %2560 = vmatpush3.bf16.msra.mxu0 %v2559_v9 }
 0x767   :  { %2561 = vmatprep.subr.bf16.mxu0 %v2857_v6 }
 0x76a   :  { %2563 = vmatpush3.bf16.msra.mxu0 %v2562_v23 }
 0x76b   :  { %2564 = vmatprep.subr.bf16.mxu0 %v2857_v6 }
 0x76e   :  { %2566 = vmatpush3.bf16.msra.mxu0 %v2565_v30 }
 0x76f   :  { %2567 = vmatprep.subr.bf16.mxu0 %v2857_v6 }
 0x772   :  { %2569 = vmatpush3.bf16.msra.mxu0 %v2568_v36 }
 0x773   :  { %2570 = vmatprep.subr.bf16.mxu0 %v2857_v6 }
 0x776   :  { %2572 = vmatpush3.bf16.msra.mxu0 %v2571_v40 }
 0x777   :  { %2573 = vmatprep.subr.bf16.mxu0 %v2857_v6 }
 0x77a   :  { %2575 = vmatpush3.bf16.msra.mxu0 %v2574_v48 }
 0x830   :  { %v1725_v49 = vpop.f32.mrb[14].mxu0  ;;  %v1796_v51 = vpop.f32.mrb[14].mxu1 }
 0x831   :  { %v2590_v53 = vadd.f32 %v1725_v49, %v3138_v14  ;;  %v1727_v55 = vpop.f32.mrb[15].mxu0  ;;  %v1798_v57 = vpop.f32.mrb[15].mxu1  ;;  %v2606_v25 = vadd.f32 %v1796_v51, %v3147_v44 }
 0x832   :  { %v2591_v59 = vadd.f32 %v1727_v55, %v3140_v16  ;;  %v2607_v0 = vadd.f32 %v1798_v57, %v3144_v37 }
 0x833   :  { %v1976_v62 = vmul.f32 -1.442695, %v2590_v53 }
 0x834   :  { %v1977_v12 = vmul.f32 -1.442695, %v2591_v59  ;;  %v1978_v22 = vmul.f32 -1.442695, %v2607_v0 }
 0x835   :  { %2762 = vpow2.f32 %v1976_v62 }
 0x836   :  { %2764 = vpow2.f32 %v1977_v12 }
 0x837   :  { %2766 = vpow2.f32 %v1978_v22 }
 0x838   :  { %2768 = vtanh.f32 %v2606_v25 }
 0x83f   :  { %v2763_v29 = vpop.eup %2762 }
 0x840   :  { %v2765_v34 = vpop.eup %2764  ;;  %v1808_v35 = vadd.f32 1.0, %v2763_v29 }
 0x841   :  { %v1814_v38 = vadd.f32 1.0, %v2765_v34  ;;  %v2767_v14 = vpop.eup %2766 }
 0x842   :  { %2770 = vrcp.f32 %v1808_v35  ;;  %v2769_v42 = vpop.eup %2768  ;;  %v1821_v54 = vadd.f32 1.0, %v2767_v14 }
 0x843   :  { %2772 = vrcp.f32 %v1814_v38 }
 0x844   :  { %2774 = vrcp.f32 %v1821_v54 }
 0x84c   :  { %v2771_v16 = vpop.eup %2770 }
 0x84d   :  { %v2773_v47 = vpop.eup %2772  ;;  %v1825_v50 = vmul.f32 %v2771_v16, %v2769_v42 }
 0x84e   :  { %v1824_v58 = vmul.f32 %v2773_v47, %v3400_v43  ;;  %v2775_v44 = vpop.eup %2774 }
 0x850   :  { %v1826_v37 = vadd.f32 %v1825_v50, %v1824_v58 }
 0x852   :  { %2776 = vtanh.f32 %v1826_v37 }
 0x85c   :  { %v2777_v61 = vpop.eup %2776 }
 0x85d   :  { %v1828_v2 = vmul.f32 %v2777_v61, %v2775_v44 }
 0x85f   :  { %2030 = vmatmul.mubr.f32.vlgmr.msra.gmra.mrb[16].mxu0 %v1828_v2 }
 0x932   :  { %v1918_v8 = vpop.f32.mrb[16].mxu0 }
 0x933   :  { %v1919_v11 = vadd.f32 %v1979_v5, %v1918_v8  ;;  %v2031_v15 = vpop.f32.mrb[17].mxu0 }
 0x935   :  { %1922 = vst [vmem:[#allocation8] sm:$0xff] %v1919_v11 }
 0x936   :  { %2833 = shalt.err (!%p2830_p6)
}
 0x937   :  { %s2834_s11 = scalar_lea.hbm %s3430_s6, 128 }
 0x938   :  { %p2835_p7 = scmp.ne.s32.totalorder %s3430_s6, %s2834_s11  ;;  %p2838_p8 = scmp.lt.u32.totalorder %s2834_s11, %s3430_s6 }
 0x93a   :  { %p2840_p9 = pnand %p2838_p8, %p2835_p7 }
 0x93c   :  { %2843 = shalt.err (!%p2840_p9)
}
 0x93d   :  { %1932 = dma.vmem_to_hbm [thread:$0]  %s1930_s7, 128, %s3430_s6, [#allocation5]  }
 0x93e   :  { %2848 = dma.done.wait [#allocation5], 128  }
 0x93f   :  { %2849 = vsyncadd [#allocation5], 4294967168 }
 0x940   :  { %1936 = vsyncpa [#allocation4], 1 }
 0x941   :  { %1937 = vsyncpa [#allocation7], 1 }
 0x942   :  { %1938 = vsyncpa [#allocation5], 1 }

</bundles_post_ra>
